<compile_context>
chip_gen: v7x
topology: tpu7x:2x2x1
jax: 0.10.0
libtpu: 0.0.40
codegen_flags: <defaults>
</compile_context>

<pallas_src>
import numpy as np
from functools import partial

import jax
import jax.numpy as jnp
from jax.experimental import pallas as pl
from jax.experimental.pallas import tpu as pltpu

# ---- scaled-down GPT config (module defaults 384/6/6; shrunk for the demo) ----
VOCAB = 256
N_LAYER = 2
N_HEAD = 4
N_EMB = 128
HEAD_DIM = N_EMB // N_HEAD
EPS = float(jnp.finfo(jnp.float32).eps)  # F.rms_norm default eps = finfo(dtype).eps


def _bf16(v):
    return v.astype(jnp.bfloat16)


def _rms(v):
    """RMSNorm over the last axis (no learned weight), f32 math."""
    return v * jax.lax.rsqrt(jnp.mean(v * v, axis=-1, keepdims=True) + EPS)


def _rms_scaled(v, s):
    """RMSNorm with an extra scalar folded into the rsqrt (rides the same mul)."""
    return v * (jax.lax.rsqrt(jnp.mean(v * v, axis=-1, keepdims=True) + EPS) * s)


# --------------- fused all-layers kernel (residual resident in VMEM) ------------

def _layers_kernel(x_ref, cos_ref, sn_ref, sp_ref,
                   qkvw_ref, ow_ref, w1_ref, w2_ref,
                   out_ref, res_ref, attn_ref, *, bb, seq):
    """grid = (batch_blocks, n_layer).  One batch block's residual stream stays in
    the `res_ref` VMEM scratch across the entire layer axis; only the final
    RMSNorm'ed bf16 activation is written back to HBM."""
    l = pl.program_id(1)
    C = res_ref.shape[-1]
    H, D = N_HEAD, HEAD_DIM
    M = bb * seq

    @pl.when(l == 0)
    def _():                                   # load the residual once per batch block
        res_ref[...] = x_ref[...]

    x = res_ref[...]                           # (M, C) f32 residual stream

    # ---------------- attention sub-block (pre-norm) ----------------
    xn = _rms(x)
    qkv = jnp.dot(_bf16(xn), qkvw_ref[0], preferred_element_type=jnp.float32)
    q = qkv[:, 0 * C:1 * C]
    k = qkv[:, 1 * C:2 * C]
    v = qkv[:, 2 * C:3 * C]

    # RoPE: rotate_half == lane pair-swap -> two XLU rolls + pre-signed/masked sin
    # constants (no MXU work; pairs never cross head boundaries since D is even).
    cos = cos_ref[...]
    sn = sn_ref[...]                           # -sin at even lanes, 0 at odd lanes
    sp = sp_ref[...]                           # 0 at even lanes, +sin at odd lanes

    def rope(t):
        return (t * cos
                + pltpu.roll(t, C - 1, axis=1) * sn      # lane j <- lane j+1
                + pltpu.roll(t, 1, axis=1) * sp)         # lane j <- lane j-1

    q = rope(q)
    k = rope(k)

    q3 = q.reshape(bb, seq, C)
    k3 = k.reshape(bb, seq, C)
    v3 = v.reshape(bb, seq, C)

    row = jax.lax.broadcasted_iota(jnp.int32, (seq, seq), 0)
    col = jax.lax.broadcasted_iota(jnp.int32, (seq, seq), 1)
    causal = col <= row
    scale = 1.0 / (D ** 0.5)

    # TODO(synk): at real T (long sequences) tile the KV axis flash-style and use
    # lax.fori_loop over heads to bound live ranges for v7x's 64 MiB VMEM.
    for h in range(H):
        sl = slice(h * D, (h + 1) * D)
        qh = _rms_scaled(q3[..., sl], scale)   # per-head q norm, 1/sqrt(D) folded in
        kh = _rms(k3[..., sl])
        vh = v3[..., sl]
        s = jnp.einsum("btd,bsd->bts", _bf16(qh), _bf16(kh),
                       preferred_element_type=jnp.float32)
        s = jnp.where(causal, s, -1e30)        # large finite (diag always unmasked)
        m = jnp.max(s, axis=-1, keepdims=True)
        p = jnp.exp(s - m)
        p = p * pl.reciprocal(jnp.sum(p, axis=-1, keepdims=True), approx=True)
        oh = jnp.einsum("bts,bsd->btd", _bf16(p), _bf16(vh),
                        preferred_element_type=jnp.float32)
        attn_ref[:, sl] = oh.reshape(M, D)     # pack heads; o_proj applied once below

    # single K=C o_proj matmul on the packed attention output
    x = x + jnp.dot(_bf16(attn_ref[...]), ow_ref[0],
                    preferred_element_type=jnp.float32)

    # ---------------- FFN sub-block (pre-norm, ReLU^2) ----------------
    xn2 = _rms(x)
    h1 = jnp.dot(_bf16(xn2), w1_ref[0], preferred_element_type=jnp.float32)
    h1 = jnp.maximum(h1, 0.0)
    h1 = h1 * h1
    x = x + jnp.dot(_bf16(h1), w2_ref[0], preferred_element_type=jnp.float32)

    res_ref[...] = x

    @pl.when(l == pl.num_programs(1) - 1)
    def _():                                   # fused final RMSNorm + bf16 cast
        out_ref[...] = _bf16(_rms(x))


def gpt_layers(x2d, cos, sin_neg, sin_pos, qkv_w, o_w, w1, w2, *, batch, seq, bb):
    M, C = x2d.shape
    n_layer = qkv_w.shape[0]
    nb = batch // bb
    mb = bb * seq
    return pl.pallas_call(
        partial(_layers_kernel, bb=bb, seq=seq),
        out_shape=jax.ShapeDtypeStruct((M, C), jnp.bfloat16),
        grid=(nb, n_layer),
        in_specs=[
            pl.BlockSpec((mb, C), lambda b, l: (b, 0)),
            pl.BlockSpec((mb, C), lambda b, l: (0, 0)),
            pl.BlockSpec((mb, C), lambda b, l: (0, 0)),
            pl.BlockSpec((mb, C), lambda b, l: (0, 0)),
            pl.BlockSpec((1, C, 3 * C), lambda b, l: (l, 0, 0)),
            pl.BlockSpec((1, C, C), lambda b, l: (l, 0, 0)),
            pl.BlockSpec((1, C, 4 * C), lambda b, l: (l, 0, 0)),
            pl.BlockSpec((1, 4 * C, C), lambda b, l: (l, 0, 0)),
        ],
        out_specs=pl.BlockSpec((mb, C), lambda b, l: (b, 0)),
        scratch_shapes=[pltpu.VMEM((mb, C), jnp.float32),    # residual stream
                        pltpu.VMEM((mb, C), jnp.float32)],   # packed attention out
        compiler_params=pltpu.CompilerParams(
            dimension_semantics=("parallel", "arbitrary"),
            vmem_limit_bytes=32 * 1024 * 1024),
    )(x2d, cos, sin_neg, sin_pos, qkv_w, o_w, w1, w2)


# ------------------------ tied LM head (norm already fused) ---------------------

def _lm_head_kernel(xn_ref, w_ref, o_ref):
    o_ref[...] = jnp.dot(xn_ref[...], w_ref[...], preferred_element_type=jnp.float32)


def lm_head(xn2d, w):
    """xn2d: (M, C) bf16, already final-RMSNorm'ed; w: (C, Vpad) bf16 tied wte."""
    M, K = xn2d.shape
    vp = w.shape[1]
    tn = 512 if vp % 512 == 0 else 256 if vp % 256 == 0 else 128
    # TODO(synk): at a real ~50k vocab also tile M (>=128 rows/step) and K with an
    # f32 VMEM accumulator; at this demo M=B*T=16 and K=C=128 fit untiled.
    return pl.pallas_call(
        _lm_head_kernel,
        out_shape=jax.ShapeDtypeStruct((M, vp), jnp.float32),
        grid=(vp // tn,),
        in_specs=[pl.BlockSpec((M, K), lambda j: (0, 0)),
                  pl.BlockSpec((K, tn), lambda j: (0, j))],
        out_specs=pl.BlockSpec((M, tn), lambda j: (0, j)),
        compiler_params=pltpu.CompilerParams(dimension_semantics=("parallel",)),
    )(xn2d, w)


# ------------------------------ host-side glue ----------------------------------

def rope_constants(T, bb):
    """Trace-time constants in the packed (bb*T, C) layout:
       cos, and two pre-signed/masked sins so that
       rotate_half(x)*sin == roll(x, C-1)*sin_neg + roll(x, 1)*sin_pos."""
    D = HEAD_DIM
    inv_freq = 1.0 / (10000.0 ** (np.arange(0, D, 2, dtype=np.float64) / D))
    t = np.arange(T, dtype=np.float64)
    freqs = np.einsum("i,j->ij", t, inv_freq)                 # (T, D/2)
    sin = np.repeat(np.sin(freqs), 2, axis=-1)                # repeat_interleave(2)
    cos = np.repeat(np.cos(freqs), 2, axis=-1)                # (T, D)
    sin_f = np.tile(sin, (1, N_HEAD))                         # (T, C) packed per head
    cos_f = np.tile(cos, (1, N_HEAD))
    even = np.zeros((1, N_EMB)); even[:, 0::2] = 1.0
    odd = 1.0 - even
    sin_neg = (-sin_f) * even                                 # -sin at even lanes
    sin_pos = sin_f * odd                                     # +sin at odd lanes

    def rep(a):                                               # tile per batch element
        return jnp.asarray(np.tile(a, (bb, 1)).astype(np.float32))

    return rep(cos_f), rep(sin_neg), rep(sin_pos)


def gpt_forward(params, idx):
    """idx: (B, T) int32 -> logits (B, T, VOCAB) f32. Eval semantics (dropout = id)."""
    B, T = idx.shape
    C = N_EMB
    x = params["wte"][idx].reshape(B * T, C)    # embedding gather (plain-JAX glue)
    # Block as many batch elements per grid step as divide B (target >=256 MXU rows).
    bb = max(1, min(B, 256 // max(T, 1)))
    while B % bb:
        bb -= 1
    cos, sin_neg, sin_pos = rope_constants(T, bb)
    xn = gpt_layers(x, cos, sin_neg, sin_pos,
                    params["qkv_w"], params["o_w"], params["ffn1_w"], params["ffn2_w"],
                    batch=B, seq=T, bb=bb)                    # (B*T, C) bf16, normed
    logits = lm_head(xn, params["lm_head_w"])                 # (B*T, Vpad) f32
    return logits[:, :VOCAB].reshape(B, T, VOCAB)


def init_params(key):
    def normal(k, shape):
        return 0.02 * jax.random.normal(k, shape, dtype=jnp.float32)

    keys = jax.random.split(key, 1 + 4 * N_LAYER)
    wte = normal(keys[0], (VOCAB, N_EMB))
    vpad = ((VOCAB + 127) // 128) * 128                       # lane-multiple vocab pad
    lm_w = jnp.zeros((N_EMB, vpad), jnp.float32).at[:, :VOCAB].set(wte.T)

    qkv_w, o_w, w1, w2 = [], [], [], []
    for l in range(N_LAYER):
        k0, k1, k2, k3 = keys[1 + 4 * l: 5 + 4 * l]
        # nn.Linear stores (out, in); pre-transpose ONCE to (in, out) then bf16.
        qkv_w.append(normal(k0, (3 * N_EMB, N_EMB)).T)
        o_w.append(normal(k1, (N_EMB, N_EMB)).T)
        w1.append(normal(k2, (4 * N_EMB, N_EMB)).T)
        w2.append(normal(k3, (N_EMB, 4 * N_EMB)).T)

    return {
        "wte": wte,                            # (V, C) f32 for the embedding gather
        "lm_head_w": _bf16(lm_w),              # tied head, (C, Vpad) bf16
        "qkv_w": _bf16(jnp.stack(qkv_w)),      # (L, C, 3C)
        "o_w": _bf16(jnp.stack(o_w)),          # (L, C, C)
        "ffn1_w": _bf16(jnp.stack(w1)),        # (L, C, 4C)
        "ffn2_w": _bf16(jnp.stack(w2)),        # (L, 4C, C)
    }


# -------- pure-JAX reference (mirrors the kernel's bf16 cast points) ------------

def gpt_forward_ref(params, idx):
    B, T = idx.shape
    H, D, C = N_HEAD, HEAD_DIM, N_EMB
    bf = lambda a: a.astype(jnp.bfloat16).astype(jnp.float32)
    f32w = lambda w: w.astype(jnp.float32)

    inv_freq = 1.0 / (10000.0 ** (np.arange(0, D, 2, dtype=np.float64) / D))
    t = np.arange(T, dtype=np.float64)
    freqs = np.einsum("i,j->ij", t, inv_freq)
    sin = jnp.asarray(np.repeat(np.sin(freqs), 2, -1).astype(np.float32))   # (T, D)
    cos = jnp.asarray(np.repeat(np.cos(freqs), 2, -1).astype(np.float32))

    def rot_half(v):
        v1, v2 = v[..., 0::2], v[..., 1::2]
        return jnp.stack((-v2, v1), axis=-1).reshape(v.shape)

    x = params["wte"][idx]
    for l in range(N_LAYER):
        xn = _rms(x)
        qkv = bf(xn) @ f32w(params["qkv_w"][l])
        qkv = qkv.reshape(B, T, 3, H, D)
        q = jnp.transpose(qkv[:, :, 0], (0, 2, 1, 3))
        k = jnp.transpose(qkv[:, :, 1], (0, 2, 1, 3))
        v = jnp.transpose(qkv[:, :, 2], (0, 2, 1, 3))
        q = q * cos + rot_half(q) * sin
        k = k * cos + rot_half(k) * sin
        q, k = _rms(q), _rms(k)
        s = jnp.einsum("bhtd,bhsd->bhts", bf(q), bf(k)) / (D ** 0.5)
        mask = jnp.tril(jnp.ones((T, T), bool))
        s = jnp.where(mask, s, -jnp.inf)
        p = jax.nn.softmax(s, axis=-1)
        o = jnp.einsum("bhts,bhsd->bhtd", bf(p), bf(v))
        o = jnp.transpose(o, (0, 2, 1, 3)).reshape(B, T, C)
        x = x + bf(o) @ f32w(params["o_w"][l])
        xn = _rms(x)
        h1 = jnp.maximum(bf(xn) @ f32w(params["ffn1_w"][l]), 0.0) ** 2
        x = x + bf(h1) @ f32w(params["ffn2_w"][l])
    x = _rms(x)
    w = f32w(params["lm_head_w"][:, :VOCAB])
    return (bf(x) @ w).reshape(B, T, VOCAB)


if __name__ == "__main__":
    key = jax.random.PRNGKey(0)
    params = init_params(key)

    B, T = 2, 8
    idx = jax.random.randint(jax.random.fold_in(key, 123), (B, T), 0, VOCAB,
                             dtype=jnp.int32)

    logits = jax.jit(gpt_forward)(params, idx)
    logits = jax.block_until_ready(logits)
    assert logits.shape == (B, T, VOCAB), logits.shape
    assert bool(jnp.all(jnp.isfinite(logits)))

    ref = jax.block_until_ready(jax.jit(gpt_forward_ref)(params, idx))
    err = float(jnp.max(jnp.abs(logits - ref)))
    assert err < 2e-2, f"max |kernel - ref| = {err}"
    print("KERNEL_OK")
</pallas_src>

<mosaic_0001>
module attributes {stable_mosaic.version = 11 : i64} {
  func.func @_layers_kernel(%arg0: i32, %arg1: i32, %arg2: memref<16x128xf32, #tpu.memory_space<vmem>>, %arg3: memref<16x128xf32, #tpu.memory_space<vmem>>, %arg4: memref<16x128xf32, #tpu.memory_space<vmem>>, %arg5: memref<16x128xf32, #tpu.memory_space<vmem>>, %arg6: memref<1x128x384xbf16, #tpu.memory_space<vmem>>, %arg7: memref<1x128x128xbf16, #tpu.memory_space<vmem>>, %arg8: memref<1x128x512xbf16, #tpu.memory_space<vmem>>, %arg9: memref<1x512x128xbf16, #tpu.memory_space<vmem>>, %arg10: memref<16x128xbf16, #tpu.memory_space<vmem>>, %arg11: memref<16x128xf32, #tpu.memory_space<vmem>>, %arg12: memref<16x128xf32, #tpu.memory_space<vmem>>) attributes {dimension_semantics = [#tpu.dimension_semantics<parallel>, #tpu.dimension_semantics<arbitrary>], iteration_bounds = array<i64: 1, 2>, scalar_prefetch = 0 : i64, scratch_operands = 2 : i64, tpu.core_type = #tpu.core_type<tc>, window_params = [{transform_indices = @transform_0, window_bounds = array<i64: 16, 128>}, {pipeline_mode = #tpu.pipeline_mode<synchronous>, transform_indices = @transform_1, window_bounds = array<i64: 16, 128>}, {pipeline_mode = #tpu.pipeline_mode<synchronous>, transform_indices = @transform_2, window_bounds = array<i64: 16, 128>}, {pipeline_mode = #tpu.pipeline_mode<synchronous>, transform_indices = @transform_3, window_bounds = array<i64: 16, 128>}, {transform_indices = @transform_4, window_bounds = array<i64: 1, 128, 384>}, {transform_indices = @transform_5, window_bounds = array<i64: 1, 128, 128>}, {transform_indices = @transform_6, window_bounds = array<i64: 1, 128, 512>}, {transform_indices = @transform_7, window_bounds = array<i64: 1, 512, 128>}, {transform_indices = @transform_8, window_bounds = array<i64: 16, 128>}]} {
    %c0_i32 = arith.constant 0 : i32
    %0 = arith.cmpi eq, %arg1, %c0_i32 : i32
    %1 = arith.extui %0 : i1 to i32
    %c0_i32_0 = arith.constant 0 : i32
    %2 = arith.cmpi ne, %1, %c0_i32_0 : i32
    scf.if %2 {
      %c0_91 = arith.constant 0 : index
      %c0_92 = arith.constant 0 : index
      %264 = vector.load %arg2[%c0_91, %c0_92] : memref<16x128xf32, #tpu.memory_space<vmem>>, vector<16x128xf32>
      %c0_93 = arith.constant 0 : index
      %c0_94 = arith.constant 0 : index
      %265 = vector.load %arg11[%c0_93, %c0_94] : memref<16x128xf32, #tpu.memory_space<vmem>>, vector<16x128xf32>
      tpu.vector_store %arg11[%c0_93, %c0_94], %264 {strides = array<i32>} : memref<16x128xf32, #tpu.memory_space<vmem>>, vector<16x128xf32>,
    } else {
    }
    %c0 = arith.constant 0 : index
    %c0_1 = arith.constant 0 : index
    %3 = vector.load %arg11[%c0, %c0_1] : memref<16x128xf32, #tpu.memory_space<vmem>>, vector<16x128xf32>
    %4 = arith.mulf %3, %3 : vector<16x128xf32>
    %cst = arith.constant dense<0.000000e+00> : vector<16xf32>
    %5 = vector.multi_reduction <add>, %4, %cst [1] : vector<16x128xf32> to vector<16xf32>
    %6 = vector.shape_cast %5 : vector<16xf32> to vector<16x1xf32>
    %cst_2 = arith.constant 1.280000e+02 : f32
    %7 = vector.broadcast %cst_2 : f32 to vector<16x1xf32>
    %8 = arith.divf %6, %7 : vector<16x1xf32>
    %cst_3 = arith.constant 1.1920929E-7 : f32
    %9 = vector.broadcast %cst_3 : f32 to vector<16x1xf32>
    %10 = arith.addf %8, %9 : vector<16x1xf32>
    %11 = math.rsqrt %10 : vector<16x1xf32>
    %12 = vector.broadcast %11 : vector<16x1xf32> to vector<16x128xf32>
    %13 = arith.mulf %3, %12 : vector<16x128xf32>
    %14 = arith.truncf %13 : vector<16x128xf32> to vector<16x128xbf16>
    %c0_4 = arith.constant 0 : index
    %c0_5 = arith.constant 0 : index
    %c0_6 = arith.constant 0 : index
    %15 = vector.load %arg6[%c0_4, %c0_5, %c0_6] : memref<1x128x384xbf16, #tpu.memory_space<vmem>>, vector<1x128x384xbf16>
    %16 = vector.shape_cast %15 : vector<1x128x384xbf16> to vector<128x384xbf16>
    %cst_7 = arith.constant dense<0.000000e+00> : vector<16x384xf32>
    %17 = tpu.matmul %14, %16, %cst_7 {dimension_numbers = #tpu.dot_dimension_numbers<[1], [0], [0], [1], [0, 0, 1, 1], [], []>} : vector<16x128xbf16>, vector<128x384xbf16>, vector<16x384xf32> -> vector<16x384xf32>
    %18 = vector.extract_strided_slice %17 {offsets = [0, 0], sizes = [16, 128], strides = [1, 1]} : vector<16x384xf32> to vector<16x128xf32>
    %19 = vector.extract_strided_slice %17 {offsets = [0, 128], sizes = [16, 128], strides = [1, 1]} : vector<16x384xf32> to vector<16x128xf32>
    %20 = vector.extract_strided_slice %17 {offsets = [0, 256], sizes = [16, 128], strides = [1, 1]} : vector<16x384xf32> to vector<16x128xf32>
    %c0_8 = arith.constant 0 : index
    %c0_9 = arith.constant 0 : index
    %21 = vector.load %arg3[%c0_8, %c0_9] : memref<16x128xf32, #tpu.memory_space<vmem>>, vector<16x128xf32>
    %c0_10 = arith.constant 0 : index
    %c0_11 = arith.constant 0 : index
    %22 = vector.load %arg4[%c0_10, %c0_11] : memref<16x128xf32, #tpu.memory_space<vmem>>, vector<16x128xf32>
    %c0_12 = arith.constant 0 : index
    %c0_13 = arith.constant 0 : index
    %23 = vector.load %arg5[%c0_12, %c0_13] : memref<16x128xf32, #tpu.memory_space<vmem>>, vector<16x128xf32>
    %24 = arith.mulf %18, %21 : vector<16x128xf32>
    %c127_i32 = arith.constant 127 : i32
    %25 = tpu.dynamic_rotate %18 by %c127_i32 dim 1 : vector<16x128xf32>, i32 -> vector<16x128xf32>
    %26 = arith.mulf %25, %22 : vector<16x128xf32>
    %27 = arith.addf %24, %26 : vector<16x128xf32>
    %c1_i32 = arith.constant 1 : i32
    %28 = tpu.dynamic_rotate %18 by %c1_i32 dim 1 : vector<16x128xf32>, i32 -> vector<16x128xf32>
    %29 = arith.mulf %28, %23 : vector<16x128xf32>
    %30 = arith.addf %27, %29 : vector<16x128xf32>
    %31 = arith.mulf %19, %21 : vector<16x128xf32>
    %c127_i32_14 = arith.constant 127 : i32
    %32 = tpu.dynamic_rotate %19 by %c127_i32_14 dim 1 : vector<16x128xf32>, i32 -> vector<16x128xf32>
    %33 = arith.mulf %32, %22 : vector<16x128xf32>
    %34 = arith.addf %31, %33 : vector<16x128xf32>
    %c1_i32_15 = arith.constant 1 : i32
    %35 = tpu.dynamic_rotate %19 by %c1_i32_15 dim 1 : vector<16x128xf32>, i32 -> vector<16x128xf32>
    %36 = arith.mulf %35, %23 : vector<16x128xf32>
    %37 = arith.addf %34, %36 : vector<16x128xf32>
    %38 = vector.shape_cast %30 : vector<16x128xf32> to vector<2x8x128xf32>
    %39 = vector.shape_cast %37 : vector<16x128xf32> to vector<2x8x128xf32>
    %40 = vector.shape_cast %20 : vector<16x128xf32> to vector<2x8x128xf32>
    %41 = tpu.iota {dimensions = array<i32: 0>} : vector<8x8xi32>
    %42 = tpu.iota {dimensions = array<i32: 1>} : vector<8x8xi32>
    %43 = arith.cmpi sle, %42, %41 : vector<8x8xi32>
    %44 = vector.extract_strided_slice %38 {offsets = [0, 0, 0], sizes = [2, 8, 32], strides = [1, 1, 1]} : vector<2x8x128xf32> to vector<2x8x32xf32>
    %45 = arith.mulf %44, %44 : vector<2x8x32xf32>
    %cst_16 = arith.constant dense<0.000000e+00> : vector<2x8xf32>
    %46 = vector.multi_reduction <add>, %45, %cst_16 [2] : vector<2x8x32xf32> to vector<2x8xf32>
    %47 = vector.shape_cast %46 : vector<2x8xf32> to vector<2x8x1xf32>
    %cst_17 = arith.constant 3.200000e+01 : f32
    %48 = vector.broadcast %cst_17 : f32 to vector<2x8x1xf32>
    %49 = arith.divf %47, %48 : vector<2x8x1xf32>
    %cst_18 = arith.constant 1.1920929E-7 : f32
    %50 = vector.broadcast %cst_18 : f32 to vector<2x8x1xf32>
    %51 = arith.addf %49, %50 : vector<2x8x1xf32>
    %52 = math.rsqrt %51 : vector<2x8x1xf32>
    %cst_19 = arith.constant 0.176776692 : f32
    %53 = vector.broadcast %cst_19 : f32 to vector<2x8x1xf32>
    %54 = arith.mulf %52, %53 : vector<2x8x1xf32>
    %55 = vector.broadcast %54 : vector<2x8x1xf32> to vector<2x8x32xf32>
    %56 = arith.mulf %44, %55 : vector<2x8x32xf32>
    %57 = vector.extract_strided_slice %39 {offsets = [0, 0, 0], sizes = [2, 8, 32], strides = [1, 1, 1]} : vector<2x8x128xf32> to vector<2x8x32xf32>
    %58 = arith.mulf %57, %57 : vector<2x8x32xf32>
    %cst_20 = arith.constant dense<0.000000e+00> : vector<2x8xf32>
    %59 = vector.multi_reduction <add>, %58, %cst_20 [2] : vector<2x8x32xf32> to vector<2x8xf32>
    %60 = vector.shape_cast %59 : vector<2x8xf32> to vector<2x8x1xf32>
    %cst_21 = arith.constant 3.200000e+01 : f32
    %61 = vector.broadcast %cst_21 : f32 to vector<2x8x1xf32>
    %62 = arith.divf %60, %61 : vector<2x8x1xf32>
    %cst_22 = arith.constant 1.1920929E-7 : f32
    %63 = vector.broadcast %cst_22 : f32 to vector<2x8x1xf32>
    %64 = arith.addf %62, %63 : vector<2x8x1xf32>
    %65 = math.rsqrt %64 : vector<2x8x1xf32>
    %66 = vector.broadcast %65 : vector<2x8x1xf32> to vector<2x8x32xf32>
    %67 = arith.mulf %57, %66 : vector<2x8x32xf32>
    %68 = vector.extract_strided_slice %40 {offsets = [0, 0, 0], sizes = [2, 8, 32], strides = [1, 1, 1]} : vector<2x8x128xf32> to vector<2x8x32xf32>
    %69 = arith.truncf %56 : vector<2x8x32xf32> to vector<2x8x32xbf16>
    %70 = arith.truncf %67 : vector<2x8x32xf32> to vector<2x8x32xbf16>
    "tpu.trace_start"() <{level = 10 : i32, message = "btd,bsd->bts"}> : () -> ()
    %cst_23 = arith.constant dense<0.000000e+00> : vector<2x8x8xf32>
    %71 = tpu.matmul %69, %70, %cst_23 {dimension_numbers = #tpu.dot_dimension_numbers<[2], [2], [1], [1], [0, 0, 0, 1, 1, 1], [0], [0]>} : vector<2x8x32xbf16>, vector<2x8x32xbf16>, vector<2x8x8xf32> -> vector<2x8x8xf32>
    %cst_24 = arith.constant -1.000000e+30 : f32
    "tpu.trace_stop"() : () -> ()
    %72 = vector.shape_cast %43 : vector<8x8xi1> to vector<1x8x8xi1>
    %73 = vector.broadcast %72 : vector<1x8x8xi1> to vector<2x8x8xi1>
    %74 = vector.broadcast %cst_24 : f32 to vector<2x8x8xf32>
    %75 = arith.select %73, %71, %74 : vector<2x8x8xi1>, vector<2x8x8xf32>
    %cst_25 = arith.constant dense<0xFF800000> : vector<2x8xf32>
    %76 = vector.multi_reduction <maximumf>, %75, %cst_25 [2] : vector<2x8x8xf32> to vector<2x8xf32>
    %77 = vector.shape_cast %76 : vector<2x8xf32> to vector<2x8x1xf32>
    %78 = vector.broadcast %77 : vector<2x8x1xf32> to vector<2x8x8xf32>
    %79 = arith.subf %75, %78 : vector<2x8x8xf32>
    %80 = math.exp %79 : vector<2x8x8xf32>
    %cst_26 = arith.constant dense<0.000000e+00> : vector<2x8xf32>
    %81 = vector.multi_reduction <add>, %80, %cst_26 [2] : vector<2x8x8xf32> to vector<2x8xf32>
    %82 = vector.shape_cast %81 : vector<2x8xf32> to vector<2x8x1xf32>
    %83 = tpu.reciprocal %82 {approx = true} : vector<2x8x1xf32> -> vector<2x8x1xf32>
    %84 = vector.broadcast %83 : vector<2x8x1xf32> to vector<2x8x8xf32>
    %85 = arith.mulf %80, %84 : vector<2x8x8xf32>
    %86 = arith.truncf %85 : vector<2x8x8xf32> to vector<2x8x8xbf16>
    %87 = arith.truncf %68 : vector<2x8x32xf32> to vector<2x8x32xbf16>
    "tpu.trace_start"() <{level = 10 : i32, message = "bts,bsd->btd"}> : () -> ()
    %cst_27 = arith.constant dense<0.000000e+00> : vector<2x8x32xf32>
    %88 = tpu.matmul %86, %87, %cst_27 {dimension_numbers = #tpu.dot_dimension_numbers<[2], [1], [1], [2], [0, 0, 0, 1, 1, 2], [0], [0]>} : vector<2x8x8xbf16>, vector<2x8x32xbf16>, vector<2x8x32xf32> -> vector<2x8x32xf32>
    "tpu.trace_stop"() : () -> ()
    %89 = vector.shape_cast %88 : vector<2x8x32xf32> to vector<16x32xf32>
    %c0_28 = arith.constant 0 : index
    %c0_29 = arith.constant 0 : index
    %90 = vector.load %arg12[%c0_28, %c0_29] : memref<16x128xf32, #tpu.memory_space<vmem>>, vector<16x32xf32>
    tpu.vector_store %arg12[%c0_28, %c0_29], %89 {strides = array<i32>} : memref<16x128xf32, #tpu.memory_space<vmem>>, vector<16x32xf32>,
    %91 = vector.extract_strided_slice %38 {offsets = [0, 0, 32], sizes = [2, 8, 32], strides = [1, 1, 1]} : vector<2x8x128xf32> to vector<2x8x32xf32>
    %92 = arith.mulf %91, %91 : vector<2x8x32xf32>
    %cst_30 = arith.constant dense<0.000000e+00> : vector<2x8xf32>
    %93 = vector.multi_reduction <add>, %92, %cst_30 [2] : vector<2x8x32xf32> to vector<2x8xf32>
    %94 = vector.shape_cast %93 : vector<2x8xf32> to vector<2x8x1xf32>
    %cst_31 = arith.constant 3.200000e+01 : f32
    %95 = vector.broadcast %cst_31 : f32 to vector<2x8x1xf32>
    %96 = arith.divf %94, %95 : vector<2x8x1xf32>
    %cst_32 = arith.constant 1.1920929E-7 : f32
    %97 = vector.broadcast %cst_32 : f32 to vector<2x8x1xf32>
    %98 = arith.addf %96, %97 : vector<2x8x1xf32>
    %99 = math.rsqrt %98 : vector<2x8x1xf32>
    %cst_33 = arith.constant 0.176776692 : f32
    %100 = vector.broadcast %cst_33 : f32 to vector<2x8x1xf32>
    %101 = arith.mulf %99, %100 : vector<2x8x1xf32>
    %102 = vector.broadcast %101 : vector<2x8x1xf32> to vector<2x8x32xf32>
    %103 = arith.mulf %91, %102 : vector<2x8x32xf32>
    %104 = vector.extract_strided_slice %39 {offsets = [0, 0, 32], sizes = [2, 8, 32], strides = [1, 1, 1]} : vector<2x8x128xf32> to vector<2x8x32xf32>
    %105 = arith.mulf %104, %104 : vector<2x8x32xf32>
    %cst_34 = arith.constant dense<0.000000e+00> : vector<2x8xf32>
    %106 = vector.multi_reduction <add>, %105, %cst_34 [2] : vector<2x8x32xf32> to vector<2x8xf32>
    %107 = vector.shape_cast %106 : vector<2x8xf32> to vector<2x8x1xf32>
    %cst_35 = arith.constant 3.200000e+01 : f32
    %108 = vector.broadcast %cst_35 : f32 to vector<2x8x1xf32>
    %109 = arith.divf %107, %108 : vector<2x8x1xf32>
    %cst_36 = arith.constant 1.1920929E-7 : f32
    %110 = vector.broadcast %cst_36 : f32 to vector<2x8x1xf32>
    %111 = arith.addf %109, %110 : vector<2x8x1xf32>
    %112 = math.rsqrt %111 : vector<2x8x1xf32>
    %113 = vector.broadcast %112 : vector<2x8x1xf32> to vector<2x8x32xf32>
    %114 = arith.mulf %104, %113 : vector<2x8x32xf32>
    %115 = vector.extract_strided_slice %40 {offsets = [0, 0, 32], sizes = [2, 8, 32], strides = [1, 1, 1]} : vector<2x8x128xf32> to vector<2x8x32xf32>
    %116 = arith.truncf %103 : vector<2x8x32xf32> to vector<2x8x32xbf16>
    %117 = arith.truncf %114 : vector<2x8x32xf32> to vector<2x8x32xbf16>
    "tpu.trace_start"() <{level = 10 : i32, message = "btd,bsd->bts"}> : () -> ()
    %cst_37 = arith.constant dense<0.000000e+00> : vector<2x8x8xf32>
    %118 = tpu.matmul %116, %117, %cst_37 {dimension_numbers = #tpu.dot_dimension_numbers<[2], [2], [1], [1], [0, 0, 0, 1, 1, 1], [0], [0]>} : vector<2x8x32xbf16>, vector<2x8x32xbf16>, vector<2x8x8xf32> -> vector<2x8x8xf32>
    %cst_38 = arith.constant -1.000000e+30 : f32
    "tpu.trace_stop"() : () -> ()
    %119 = vector.shape_cast %43 : vector<8x8xi1> to vector<1x8x8xi1>
    %120 = vector.broadcast %119 : vector<1x8x8xi1> to vector<2x8x8xi1>
    %121 = vector.broadcast %cst_38 : f32 to vector<2x8x8xf32>
    %122 = arith.select %120, %118, %121 : vector<2x8x8xi1>, vector<2x8x8xf32>
    %cst_39 = arith.constant dense<0xFF800000> : vector<2x8xf32>
    %123 = vector.multi_reduction <maximumf>, %122, %cst_39 [2] : vector<2x8x8xf32> to vector<2x8xf32>
    %124 = vector.shape_cast %123 : vector<2x8xf32> to vector<2x8x1xf32>
    %125 = vector.broadcast %124 : vector<2x8x1xf32> to vector<2x8x8xf32>
    %126 = arith.subf %122, %125 : vector<2x8x8xf32>
    %127 = math.exp %126 : vector<2x8x8xf32>
    %cst_40 = arith.constant dense<0.000000e+00> : vector<2x8xf32>
    %128 = vector.multi_reduction <add>, %127, %cst_40 [2] : vector<2x8x8xf32> to vector<2x8xf32>
    %129 = vector.shape_cast %128 : vector<2x8xf32> to vector<2x8x1xf32>
    %130 = tpu.reciprocal %129 {approx = true} : vector<2x8x1xf32> -> vector<2x8x1xf32>
    %131 = vector.broadcast %130 : vector<2x8x1xf32> to vector<2x8x8xf32>
    %132 = arith.mulf %127, %131 : vector<2x8x8xf32>
    %133 = arith.truncf %132 : vector<2x8x8xf32> to vector<2x8x8xbf16>
    %134 = arith.truncf %115 : vector<2x8x32xf32> to vector<2x8x32xbf16>
    "tpu.trace_start"() <{level = 10 : i32, message = "bts,bsd->btd"}> : () -> ()
    %cst_41 = arith.constant dense<0.000000e+00> : vector<2x8x32xf32>
    %135 = tpu.matmul %133, %134, %cst_41 {dimension_numbers = #tpu.dot_dimension_numbers<[2], [1], [1], [2], [0, 0, 0, 1, 1, 2], [0], [0]>} : vector<2x8x8xbf16>, vector<2x8x32xbf16>, vector<2x8x32xf32> -> vector<2x8x32xf32>
    "tpu.trace_stop"() : () -> ()
    %136 = vector.shape_cast %135 : vector<2x8x32xf32> to vector<16x32xf32>
    %c0_42 = arith.constant 0 : index
    %c32 = arith.constant 32 : index
    %137 = vector.load %arg12[%c0_42, %c32] : memref<16x128xf32, #tpu.memory_space<vmem>>, vector<16x32xf32>
    tpu.vector_store %arg12[%c0_42, %c32], %136 {strides = array<i32>} : memref<16x128xf32, #tpu.memory_space<vmem>>, vector<16x32xf32>,
    %138 = vector.extract_strided_slice %38 {offsets = [0, 0, 64], sizes = [2, 8, 32], strides = [1, 1, 1]} : vector<2x8x128xf32> to vector<2x8x32xf32>
    %139 = arith.mulf %138, %138 : vector<2x8x32xf32>
    %cst_43 = arith.constant dense<0.000000e+00> : vector<2x8xf32>
    %140 = vector.multi_reduction <add>, %139, %cst_43 [2] : vector<2x8x32xf32> to vector<2x8xf32>
    %141 = vector.shape_cast %140 : vector<2x8xf32> to vector<2x8x1xf32>
    %cst_44 = arith.constant 3.200000e+01 : f32
    %142 = vector.broadcast %cst_44 : f32 to vector<2x8x1xf32>
    %143 = arith.divf %141, %142 : vector<2x8x1xf32>
    %cst_45 = arith.constant 1.1920929E-7 : f32
    %144 = vector.broadcast %cst_45 : f32 to vector<2x8x1xf32>
    %145 = arith.addf %143, %144 : vector<2x8x1xf32>
    %146 = math.rsqrt %145 : vector<2x8x1xf32>
    %cst_46 = arith.constant 0.176776692 : f32
    %147 = vector.broadcast %cst_46 : f32 to vector<2x8x1xf32>
    %148 = arith.mulf %146, %147 : vector<2x8x1xf32>
    %149 = vector.broadcast %148 : vector<2x8x1xf32> to vector<2x8x32xf32>
    %150 = arith.mulf %138, %149 : vector<2x8x32xf32>
    %151 = vector.extract_strided_slice %39 {offsets = [0, 0, 64], sizes = [2, 8, 32], strides = [1, 1, 1]} : vector<2x8x128xf32> to vector<2x8x32xf32>
    %152 = arith.mulf %151, %151 : vector<2x8x32xf32>
    %cst_47 = arith.constant dense<0.000000e+00> : vector<2x8xf32>
    %153 = vector.multi_reduction <add>, %152, %cst_47 [2] : vector<2x8x32xf32> to vector<2x8xf32>
    %154 = vector.shape_cast %153 : vector<2x8xf32> to vector<2x8x1xf32>
    %cst_48 = arith.constant 3.200000e+01 : f32
    %155 = vector.broadcast %cst_48 : f32 to vector<2x8x1xf32>
    %156 = arith.divf %154, %155 : vector<2x8x1xf32>
    %cst_49 = arith.constant 1.1920929E-7 : f32
    %157 = vector.broadcast %cst_49 : f32 to vector<2x8x1xf32>
    %158 = arith.addf %156, %157 : vector<2x8x1xf32>
    %159 = math.rsqrt %158 : vector<2x8x1xf32>
    %160 = vector.broadcast %159 : vector<2x8x1xf32> to vector<2x8x32xf32>
    %161 = arith.mulf %151, %160 : vector<2x8x32xf32>
    %162 = vector.extract_strided_slice %40 {offsets = [0, 0, 64], sizes = [2, 8, 32], strides = [1, 1, 1]} : vector<2x8x128xf32> to vector<2x8x32xf32>
    %163 = arith.truncf %150 : vector<2x8x32xf32> to vector<2x8x32xbf16>
    %164 = arith.truncf %161 : vector<2x8x32xf32> to vector<2x8x32xbf16>
    "tpu.trace_start"() <{level = 10 : i32, message = "btd,bsd->bts"}> : () -> ()
    %cst_50 = arith.constant dense<0.000000e+00> : vector<2x8x8xf32>
    %165 = tpu.matmul %163, %164, %cst_50 {dimension_numbers = #tpu.dot_dimension_numbers<[2], [2], [1], [1], [0, 0, 0, 1, 1, 1], [0], [0]>} : vector<2x8x32xbf16>, vector<2x8x32xbf16>, vector<2x8x8xf32> -> vector<2x8x8xf32>
    %cst_51 = arith.constant -1.000000e+30 : f32
    "tpu.trace_stop"() : () -> ()
    %166 = vector.shape_cast %43 : vector<8x8xi1> to vector<1x8x8xi1>
    %167 = vector.broadcast %166 : vector<1x8x8xi1> to vector<2x8x8xi1>
    %168 = vector.broadcast %cst_51 : f32 to vector<2x8x8xf32>
    %169 = arith.select %167, %165, %168 : vector<2x8x8xi1>, vector<2x8x8xf32>
    %cst_52 = arith.constant dense<0xFF800000> : vector<2x8xf32>
    %170 = vector.multi_reduction <maximumf>, %169, %cst_52 [2] : vector<2x8x8xf32> to vector<2x8xf32>
    %171 = vector.shape_cast %170 : vector<2x8xf32> to vector<2x8x1xf32>
    %172 = vector.broadcast %171 : vector<2x8x1xf32> to vector<2x8x8xf32>
    %173 = arith.subf %169, %172 : vector<2x8x8xf32>
    %174 = math.exp %173 : vector<2x8x8xf32>
    %cst_53 = arith.constant dense<0.000000e+00> : vector<2x8xf32>
    %175 = vector.multi_reduction <add>, %174, %cst_53 [2] : vector<2x8x8xf32> to vector<2x8xf32>
    %176 = vector.shape_cast %175 : vector<2x8xf32> to vector<2x8x1xf32>
    %177 = tpu.reciprocal %176 {approx = true} : vector<2x8x1xf32> -> vector<2x8x1xf32>
    %178 = vector.broadcast %177 : vector<2x8x1xf32> to vector<2x8x8xf32>
    %179 = arith.mulf %174, %178 : vector<2x8x8xf32>
    %180 = arith.truncf %179 : vector<2x8x8xf32> to vector<2x8x8xbf16>
    %181 = arith.truncf %162 : vector<2x8x32xf32> to vector<2x8x32xbf16>
    "tpu.trace_start"() <{level = 10 : i32, message = "bts,bsd->btd"}> : () -> ()
    %cst_54 = arith.constant dense<0.000000e+00> : vector<2x8x32xf32>
    %182 = tpu.matmul %180, %181, %cst_54 {dimension_numbers = #tpu.dot_dimension_numbers<[2], [1], [1], [2], [0, 0, 0, 1, 1, 2], [0], [0]>} : vector<2x8x8xbf16>, vector<2x8x32xbf16>, vector<2x8x32xf32> -> vector<2x8x32xf32>
    "tpu.trace_stop"() : () -> ()
    %183 = vector.shape_cast %182 : vector<2x8x32xf32> to vector<16x32xf32>
    %c0_55 = arith.constant 0 : index
    %c64 = arith.constant 64 : index
    %184 = vector.load %arg12[%c0_55, %c64] : memref<16x128xf32, #tpu.memory_space<vmem>>, vector<16x32xf32>
    tpu.vector_store %arg12[%c0_55, %c64], %183 {strides = array<i32>} : memref<16x128xf32, #tpu.memory_space<vmem>>, vector<16x32xf32>,
    %185 = vector.extract_strided_slice %38 {offsets = [0, 0, 96], sizes = [2, 8, 32], strides = [1, 1, 1]} : vector<2x8x128xf32> to vector<2x8x32xf32>
    %186 = arith.mulf %185, %185 : vector<2x8x32xf32>
    %cst_56 = arith.constant dense<0.000000e+00> : vector<2x8xf32>
    %187 = vector.multi_reduction <add>, %186, %cst_56 [2] : vector<2x8x32xf32> to vector<2x8xf32>
    %188 = vector.shape_cast %187 : vector<2x8xf32> to vector<2x8x1xf32>
    %cst_57 = arith.constant 3.200000e+01 : f32
    %189 = vector.broadcast %cst_57 : f32 to vector<2x8x1xf32>
    %190 = arith.divf %188, %189 : vector<2x8x1xf32>
    %cst_58 = arith.constant 1.1920929E-7 : f32
    %191 = vector.broadcast %cst_58 : f32 to vector<2x8x1xf32>
    %192 = arith.addf %190, %191 : vector<2x8x1xf32>
    %193 = math.rsqrt %192 : vector<2x8x1xf32>
    %cst_59 = arith.constant 0.176776692 : f32
    %194 = vector.broadcast %cst_59 : f32 to vector<2x8x1xf32>
    %195 = arith.mulf %193, %194 : vector<2x8x1xf32>
    %196 = vector.broadcast %195 : vector<2x8x1xf32> to vector<2x8x32xf32>
    %197 = arith.mulf %185, %196 : vector<2x8x32xf32>
    %198 = vector.extract_strided_slice %39 {offsets = [0, 0, 96], sizes = [2, 8, 32], strides = [1, 1, 1]} : vector<2x8x128xf32> to vector<2x8x32xf32>
    %199 = arith.mulf %198, %198 : vector<2x8x32xf32>
    %cst_60 = arith.constant dense<0.000000e+00> : vector<2x8xf32>
    %200 = vector.multi_reduction <add>, %199, %cst_60 [2] : vector<2x8x32xf32> to vector<2x8xf32>
    %201 = vector.shape_cast %200 : vector<2x8xf32> to vector<2x8x1xf32>
    %cst_61 = arith.constant 3.200000e+01 : f32
    %202 = vector.broadcast %cst_61 : f32 to vector<2x8x1xf32>
    %203 = arith.divf %201, %202 : vector<2x8x1xf32>
    %cst_62 = arith.constant 1.1920929E-7 : f32
    %204 = vector.broadcast %cst_62 : f32 to vector<2x8x1xf32>
    %205 = arith.addf %203, %204 : vector<2x8x1xf32>
    %206 = math.rsqrt %205 : vector<2x8x1xf32>
    %207 = vector.broadcast %206 : vector<2x8x1xf32> to vector<2x8x32xf32>
    %208 = arith.mulf %198, %207 : vector<2x8x32xf32>
    %209 = vector.extract_strided_slice %40 {offsets = [0, 0, 96], sizes = [2, 8, 32], strides = [1, 1, 1]} : vector<2x8x128xf32> to vector<2x8x32xf32>
    %210 = arith.truncf %197 : vector<2x8x32xf32> to vector<2x8x32xbf16>
    %211 = arith.truncf %208 : vector<2x8x32xf32> to vector<2x8x32xbf16>
    "tpu.trace_start"() <{level = 10 : i32, message = "btd,bsd->bts"}> : () -> ()
    %cst_63 = arith.constant dense<0.000000e+00> : vector<2x8x8xf32>
    %212 = tpu.matmul %210, %211, %cst_63 {dimension_numbers = #tpu.dot_dimension_numbers<[2], [2], [1], [1], [0, 0, 0, 1, 1, 1], [0], [0]>} : vector<2x8x32xbf16>, vector<2x8x32xbf16>, vector<2x8x8xf32> -> vector<2x8x8xf32>
    %cst_64 = arith.constant -1.000000e+30 : f32
    "tpu.trace_stop"() : () -> ()
    %213 = vector.shape_cast %43 : vector<8x8xi1> to vector<1x8x8xi1>
    %214 = vector.broadcast %213 : vector<1x8x8xi1> to vector<2x8x8xi1>
    %215 = vector.broadcast %cst_64 : f32 to vector<2x8x8xf32>
    %216 = arith.select %214, %212, %215 : vector<2x8x8xi1>, vector<2x8x8xf32>
    %cst_65 = arith.constant dense<0xFF800000> : vector<2x8xf32>
    %217 = vector.multi_reduction <maximumf>, %216, %cst_65 [2] : vector<2x8x8xf32> to vector<2x8xf32>
    %218 = vector.shape_cast %217 : vector<2x8xf32> to vector<2x8x1xf32>
    %219 = vector.broadcast %218 : vector<2x8x1xf32> to vector<2x8x8xf32>
    %220 = arith.subf %216, %219 : vector<2x8x8xf32>
    %221 = math.exp %220 : vector<2x8x8xf32>
    %cst_66 = arith.constant dense<0.000000e+00> : vector<2x8xf32>
    %222 = vector.multi_reduction <add>, %221, %cst_66 [2] : vector<2x8x8xf32> to vector<2x8xf32>
    %223 = vector.shape_cast %222 : vector<2x8xf32> to vector<2x8x1xf32>
    %224 = tpu.reciprocal %223 {approx = true} : vector<2x8x1xf32> -> vector<2x8x1xf32>
    %225 = vector.broadcast %224 : vector<2x8x1xf32> to vector<2x8x8xf32>
    %226 = arith.mulf %221, %225 : vector<2x8x8xf32>
    %227 = arith.truncf %226 : vector<2x8x8xf32> to vector<2x8x8xbf16>
    %228 = arith.truncf %209 : vector<2x8x32xf32> to vector<2x8x32xbf16>
    "tpu.trace_start"() <{level = 10 : i32, message = "bts,bsd->btd"}> : () -> ()
    %cst_67 = arith.constant dense<0.000000e+00> : vector<2x8x32xf32>
    %229 = tpu.matmul %227, %228, %cst_67 {dimension_numbers = #tpu.dot_dimension_numbers<[2], [1], [1], [2], [0, 0, 0, 1, 1, 2], [0], [0]>} : vector<2x8x8xbf16>, vector<2x8x32xbf16>, vector<2x8x32xf32> -> vector<2x8x32xf32>
    "tpu.trace_stop"() : () -> ()
    %230 = vector.shape_cast %229 : vector<2x8x32xf32> to vector<16x32xf32>
    %c0_68 = arith.constant 0 : index
    %c96 = arith.constant 96 : index
    %231 = vector.load %arg12[%c0_68, %c96] : memref<16x128xf32, #tpu.memory_space<vmem>>, vector<16x32xf32>
    tpu.vector_store %arg12[%c0_68, %c96], %230 {strides = array<i32>} : memref<16x128xf32, #tpu.memory_space<vmem>>, vector<16x32xf32>,
    %c0_69 = arith.constant 0 : index
    %c0_70 = arith.constant 0 : index
    %232 = vector.load %arg12[%c0_69, %c0_70] : memref<16x128xf32, #tpu.memory_space<vmem>>, vector<16x128xf32>
    %233 = arith.truncf %232 : vector<16x128xf32> to vector<16x128xbf16>
    %c0_71 = arith.constant 0 : index
    %c0_72 = arith.constant 0 : index
    %c0_73 = arith.constant 0 : index
    %234 = vector.load %arg7[%c0_71, %c0_72, %c0_73] : memref<1x128x128xbf16, #tpu.memory_space<vmem>>, vector<1x128x128xbf16>
    %235 = vector.shape_cast %234 : vector<1x128x128xbf16> to vector<128x128xbf16>
    %cst_74 = arith.constant dense<0.000000e+00> : vector<16x128xf32>
    %236 = tpu.matmul %233, %235, %cst_74 {dimension_numbers = #tpu.dot_dimension_numbers<[1], [0], [0], [1], [0, 0, 1, 1], [], []>} : vector<16x128xbf16>, vector<128x128xbf16>, vector<16x128xf32> -> vector<16x128xf32>
    %237 = arith.addf %3, %236 : vector<16x128xf32>
    %238 = arith.mulf %237, %237 : vector<16x128xf32>
    %cst_75 = arith.constant dense<0.000000e+00> : vector<16xf32>
    %239 = vector.multi_reduction <add>, %238, %cst_75 [1] : vector<16x128xf32> to vector<16xf32>
    %240 = vector.shape_cast %239 : vector<16xf32> to vector<16x1xf32>
    %cst_76 = arith.constant 1.280000e+02 : f32
    %241 = vector.broadcast %cst_76 : f32 to vector<16x1xf32>
    %242 = arith.divf %240, %241 : vector<16x1xf32>
    %cst_77 = arith.constant 1.1920929E-7 : f32
    %243 = vector.broadcast %cst_77 : f32 to vector<16x1xf32>
    %244 = arith.addf %242, %243 : vector<16x1xf32>
    %245 = math.rsqrt %244 : vector<16x1xf32>
    %246 = vector.broadcast %245 : vector<16x1xf32> to vector<16x128xf32>
    %247 = arith.mulf %237, %246 : vector<16x128xf32>
    %248 = arith.truncf %247 : vector<16x128xf32> to vector<16x128xbf16>
    %c0_78 = arith.constant 0 : index
    %c0_79 = arith.constant 0 : index
    %c0_80 = arith.constant 0 : index
    %249 = vector.load %arg8[%c0_78, %c0_79, %c0_80] : memref<1x128x512xbf16, #tpu.memory_space<vmem>>, vector<1x128x512xbf16>
    %250 = vector.shape_cast %249 : vector<1x128x512xbf16> to vector<128x512xbf16>
    %cst_81 = arith.constant dense<0.000000e+00> : vector<16x512xf32>
    %251 = tpu.matmul %248, %250, %cst_81 {dimension_numbers = #tpu.dot_dimension_numbers<[1], [0], [0], [1], [0, 0, 1, 1], [], []>} : vector<16x128xbf16>, vector<128x512xbf16>, vector<16x512xf32> -> vector<16x512xf32>
    %cst_82 = arith.constant 0.000000e+00 : f32
    %252 = vector.broadcast %cst_82 : f32 to vector<16x512xf32>
    %253 = arith.maximumf %251, %252 : vector<16x512xf32>
    %254 = arith.mulf %253, %253 : vector<16x512xf32>
    %255 = arith.truncf %254 : vector<16x512xf32> to vector<16x512xbf16>
    %c0_83 = arith.constant 0 : index
    %c0_84 = arith.constant 0 : index
    %c0_85 = arith.constant 0 : index
    %256 = vector.load %arg9[%c0_83, %c0_84, %c0_85] : memref<1x512x128xbf16, #tpu.memory_space<vmem>>, vector<1x512x128xbf16>
    %257 = vector.shape_cast %256 : vector<1x512x128xbf16> to vector<512x128xbf16>
    %cst_86 = arith.constant dense<0.000000e+00> : vector<16x128xf32>
    %258 = tpu.matmul %255, %257, %cst_86 {dimension_numbers = #tpu.dot_dimension_numbers<[1], [0], [0], [1], [0, 0, 1, 1], [], []>} : vector<16x512xbf16>, vector<512x128xbf16>, vector<16x128xf32> -> vector<16x128xf32>
    %259 = arith.addf %237, %258 : vector<16x128xf32>
    %c0_87 = arith.constant 0 : index
    %c0_88 = arith.constant 0 : index
    %260 = vector.load %arg11[%c0_87, %c0_88] : memref<16x128xf32, #tpu.memory_space<vmem>>, vector<16x128xf32>
    tpu.vector_store %arg11[%c0_87, %c0_88], %259 {strides = array<i32>} : memref<16x128xf32, #tpu.memory_space<vmem>>, vector<16x128xf32>,
    %c1_i32_89 = arith.constant 1 : i32
    %261 = arith.cmpi eq, %arg1, %c1_i32_89 : i32
    %262 = arith.extui %261 : i1 to i32
    %c0_i32_90 = arith.constant 0 : i32
    %263 = arith.cmpi ne, %262, %c0_i32_90 : i32
    scf.if %263 {
      %264 = arith.mulf %259, %259 : vector<16x128xf32>
      %cst_91 = arith.constant dense<0.000000e+00> : vector<16xf32>
      %265 = vector.multi_reduction <add>, %264, %cst_91 [1] : vector<16x128xf32> to vector<16xf32>
      %266 = vector.shape_cast %265 : vector<16xf32> to vector<16x1xf32>
      %cst_92 = arith.constant 1.280000e+02 : f32
      %267 = vector.broadcast %cst_92 : f32 to vector<16x1xf32>
      %268 = arith.divf %266, %267 : vector<16x1xf32>
      %cst_93 = arith.constant 1.1920929E-7 : f32
      %269 = vector.broadcast %cst_93 : f32 to vector<16x1xf32>
      %270 = arith.addf %268, %269 : vector<16x1xf32>
      %271 = math.rsqrt %270 : vector<16x1xf32>
      %272 = vector.broadcast %271 : vector<16x1xf32> to vector<16x128xf32>
      %273 = arith.mulf %259, %272 : vector<16x128xf32>
      %274 = arith.truncf %273 : vector<16x128xf32> to vector<16x128xbf16>
      %c0_94 = arith.constant 0 : index
      %c0_95 = arith.constant 0 : index
      %275 = vector.load %arg10[%c0_94, %c0_95] : memref<16x128xbf16, #tpu.memory_space<vmem>>, vector<16x128xbf16>
      tpu.vector_store %arg10[%c0_94, %c0_95], %274 {strides = array<i32>} : memref<16x128xbf16, #tpu.memory_space<vmem>>, vector<16x128xbf16>,
    } else {
    }
    return
  }
  func.func @transform_0(%arg0: i32, %arg1: i32) -> (i32, i32) {
    %c0_i32 = arith.constant 0 : i32
    %c0_i32_0 = arith.constant 0 : i32
    return %arg0, %c0_i32 : i32, i32
  }
  func.func @transform_1(%arg0: i32, %arg1: i32) -> (i32, i32) {
    %c0_i32 = arith.constant 0 : i32
    %c0_i32_0 = arith.constant 0 : i32
    %c0_i32_1 = arith.constant 0 : i32
    return %c0_i32, %c0_i32_0 : i32, i32
  }
  func.func @transform_2(%arg0: i32, %arg1: i32) -> (i32, i32) {
    %c0_i32 = arith.constant 0 : i32
    %c0_i32_0 = arith.constant 0 : i32
    %c0_i32_1 = arith.constant 0 : i32
    return %c0_i32, %c0_i32_0 : i32, i32
  }
  func.func @transform_3(%arg0: i32, %arg1: i32) -> (i32, i32) {
    %c0_i32 = arith.constant 0 : i32
    %c0_i32_0 = arith.constant 0 : i32
    %c0_i32_1 = arith.constant 0 : i32
    return %c0_i32, %c0_i32_0 : i32, i32
  }
  func.func @transform_4(%arg0: i32, %arg1: i32) -> (i32, i32, i32) {
    %c0_i32 = arith.constant 0 : i32
    %c0_i32_0 = arith.constant 0 : i32
    %c0_i32_1 = arith.constant 0 : i32
    return %arg1, %c0_i32, %c0_i32_0 : i32, i32, i32
  }
  func.func @transform_5(%arg0: i32, %arg1: i32) -> (i32, i32, i32) {
    %c0_i32 = arith.constant 0 : i32
    %c0_i32_0 = arith.constant 0 : i32
    %c0_i32_1 = arith.constant 0 : i32
    return %arg1, %c0_i32, %c0_i32_0 : i32, i32, i32
  }
  func.func @transform_6(%arg0: i32, %arg1: i32) -> (i32, i32, i32) {
    %c0_i32 = arith.constant 0 : i32
    %c0_i32_0 = arith.constant 0 : i32
    %c0_i32_1 = arith.constant 0 : i32
    return %arg1, %c0_i32, %c0_i32_0 : i32, i32, i32
  }
  func.func @transform_7(%arg0: i32, %arg1: i32) -> (i32, i32, i32) {
    %c0_i32 = arith.constant 0 : i32
    %c0_i32_0 = arith.constant 0 : i32
    %c0_i32_1 = arith.constant 0 : i32
    return %arg1, %c0_i32, %c0_i32_0 : i32, i32, i32
  }
  func.func @transform_8(%arg0: i32, %arg1: i32) -> (i32, i32) {
    %c0_i32 = arith.constant 0 : i32
    %c0_i32_0 = arith.constant 0 : i32
    return %arg0, %c0_i32 : i32, i32
  }
}

module attributes {stable_mosaic.version = 11 : i64} {
  func.func @_lm_head_kernel(%arg0: i32, %arg1: memref<16x128xbf16, #tpu.memory_space<vmem>>, %arg2: memref<128x256xbf16, #tpu.memory_space<vmem>>, %arg3: memref<16x256xf32, #tpu.memory_space<vmem>>) attributes {dimension_semantics = [#tpu.dimension_semantics<parallel>], iteration_bounds = array<i64: 1>, scalar_prefetch = 0 : i64, scratch_operands = 0 : i64, tpu.core_type = #tpu.core_type<tc>, window_params = [{pipeline_mode = #tpu.pipeline_mode<synchronous>, transform_indices = @transform_0, window_bounds = array<i64: 16, 128>}, {transform_indices = @transform_1, window_bounds = array<i64: 128, 256>}, {transform_indices = @transform_2, window_bounds = array<i64: 16, 256>}]} {
    %c0 = arith.constant 0 : index
    %c0_0 = arith.constant 0 : index
    %0 = vector.load %arg1[%c0, %c0_0] : memref<16x128xbf16, #tpu.memory_space<vmem>>, vector<16x128xbf16>
    %c0_1 = arith.constant 0 : index
    %c0_2 = arith.constant 0 : index
    %1 = vector.load %arg2[%c0_1, %c0_2] : memref<128x256xbf16, #tpu.memory_space<vmem>>, vector<128x256xbf16>
    %cst = arith.constant dense<0.000000e+00> : vector<16x256xf32>
    %2 = tpu.matmul %0, %1, %cst {dimension_numbers = #tpu.dot_dimension_numbers<[1], [0], [0], [1], [0, 0, 1, 1], [], []>} : vector<16x128xbf16>, vector<128x256xbf16>, vector<16x256xf32> -> vector<16x256xf32>
    %c0_3 = arith.constant 0 : index
    %c0_4 = arith.constant 0 : index
    %3 = vector.load %arg3[%c0_3, %c0_4] : memref<16x256xf32, #tpu.memory_space<vmem>>, vector<16x256xf32>
    tpu.vector_store %arg3[%c0_3, %c0_4], %2 {strides = array<i32>} : memref<16x256xf32, #tpu.memory_space<vmem>>, vector<16x256xf32>,
    return
  }
  func.func @transform_0(%arg0: i32) -> (i32, i32) {
    %c0_i32 = arith.constant 0 : i32
    %c0_i32_0 = arith.constant 0 : i32
    %c0_i32_1 = arith.constant 0 : i32
    return %c0_i32, %c0_i32_0 : i32, i32
  }
  func.func @transform_1(%arg0: i32) -> (i32, i32) {
    %c0_i32 = arith.constant 0 : i32
    %c0_i32_0 = arith.constant 0 : i32
    return %c0_i32, %arg0 : i32, i32
  }
  func.func @transform_2(%arg0: i32) -> (i32, i32) {
    %c0_i32 = arith.constant 0 : i32
    %c0_i32_0 = arith.constant 0 : i32
    return %c0_i32, %arg0 : i32, i32
  }
}

</mosaic_0001>

<bundles_post_ra>
// kernel: gpt_forward.3
= control target key start
LH: loop header
LB: loop body
LE: loop exit
PB: predicated region body
PF: predicated region fallthrough
CT: control target
= control target key end

     0   :  { %v250_v2 = vmov 0   ;;  %s332_s0 = inlined_call_operand.vmem [shape: bf16[16,128], index: 0, kind: input, shape index: {}]   ;;  %s333_s1 = inlined_call_operand.vmem [shape: bf16[128,256], index: 1, kind: input, shape index: {}]   ;;  %s334_s2 = inlined_call_operand.hbm [shape: f32[16,256], index: 2, kind: output, shape index: {}]  }
   0x1   :  { %v201_v0 = vld [vmem:[%s333_s1 + $0x4] ss:$8 sps:$4 sm:$0xff]   ;;  %v203_v1 = vld [vmem:[%s333_s1] ss:$8 sps:$4 sm:$0xff]   ;;  %149 = vmatprep.mubr.bf16.mxu0 %v250_v2  ;;  %v204_v3 = vld [vmem:[%s333_s1 + $0x14] ss:$8 sps:$4 sm:$0xff]  }
   0x2   :  { %117 = vmatprep.subr.bf16.mxu0 %v201_v0  ;;  %v206_v4 = vld [vmem:[%s333_s1 + $0x10] ss:$8 sps:$4 sm:$0xff]   ;;  %v207_v5 = vld [vmem:[%s333_s1 + $0x24] ss:$8 sps:$4 sm:$0xff]   ;;  %v209_v6 = vld [vmem:[%s333_s1 + $0x20] ss:$8 sps:$4 sm:$0xff]  }
   0x3   :  { %118 = vmatpush1.bf16.msra.mxu0 %v203_v1  ;;  %v210_v7 = vld [vmem:[%s333_s1 + $0x34] ss:$8 sps:$4 sm:$0xff]   ;;  %v212_v8 = vld [vmem:[%s333_s1 + $0x30] ss:$8 sps:$4 sm:$0xff]  }
   0x4   :  { %119 = vmatprep.subr.bf16.mxu0 %v204_v3 }
   0x7   :  { %120 = vmatpush1.bf16.msra.mxu0 %v206_v4 }
   0x8   :  { %121 = vmatprep.subr.bf16.mxu0 %v207_v5 }
   0xb   :  { %122 = vmatpush1.bf16.msra.mxu0 %v209_v6 }
   0xc   :  { %7 = vsyncpa [#allocation3], 0  ;;  %123 = vmatprep.subr.bf16.mxu0 %v210_v7  ;;  %v213_v9 = vld [vmem:[%s333_s1 + $0x44] ss:$8 sps:$4 sm:$0xff]   ;;  %v215_v10 = vld [vmem:[%s333_s1 + $0x40] ss:$8 sps:$4 sm:$0xff]  }
   0xd   :  { %v216_v11 = vld [vmem:[%s333_s1 + $0x54] ss:$8 sps:$4 sm:$0xff]   ;;  %v218_v12 = vld [vmem:[%s333_s1 + $0x50] ss:$8 sps:$4 sm:$0xff]   ;;  %v219_v13 = vld [vmem:[%s333_s1 + $0x64] ss:$8 sps:$4 sm:$0xff]  }
   0xe   :  { %v221_v14 = vld [vmem:[%s333_s1 + $0x60] ss:$8 sps:$4 sm:$0xff]   ;;  %v222_v15 = vld [vmem:[%s333_s1 + $0x74] ss:$8 sps:$4 sm:$0xff]   ;;  %v224_v16 = vld [vmem:[%s333_s1 + $0x70] ss:$8 sps:$4 sm:$0xff]  }
   0xf   :  { %124 = vmatpush1.bf16.msra.mxu0 %v212_v8  ;;  %v225_v17 = vld [vmem:[%s332_s0] sm:$0xff]   ;;  %s251_s15 = smov [#allocation2]  }
  0x10   :  { %125 = vmatprep.subr.bf16.mxu0 %v213_v9  ;;  %s169_s16 = sshll.u32 %s251_s15, 4  ;;  %s170_s16 = int_to_ptr.vmem [resolvable:$true] %s169_s16 }
  0x11   :  { %s226_s17 = scalar_lea.vmem %s170_s16, 512  ;;  %p231_p1 = scmp.lt.s32.totalorder %s170_s16, %s170_s16 }
  0x12   :  { %p227_p0 = scmp.ne.s32.totalorder %s170_s16, %s226_s17  ;;  %p232_p2 = scmp.lt.s32.totalorder %s226_s17, %s226_s17 }
  0x13   :  { %126 = vmatpush1.bf16.msra.mxu0 %v215_v10 }
  0x14   :  { %127 = vmatprep.subr.bf16.mxu0 %v216_v11  ;;  %p233_p3 = por %p232_p2, %p231_p1 }
  0x16   :  { %p234_p4 = pnand %p233_p3, %p227_p0 }
  0x17   :  { %128 = vmatpush1.bf16.msra.mxu0 %v218_v12 }
  0x18   :  { %129 = vmatprep.subr.bf16.mxu0 %v219_v13 }
  0x1b   :  { %130 = vmatpush1.bf16.msra.mxu0 %v221_v14 }
  0x1c   :  { %131 = vmatprep.subr.bf16.mxu0 %v222_v15 }
  0x1f   :  { %132 = vmatpush1.bf16.msra.mxu0 %v224_v16 }
  0x22   :  { %150 = vmatmul.mubr.bf16.vlgmr.msra.gmra.mrb[0].mxu0 %v225_v17 }
  0xf5   :  { %v151_v18 = vpop.f32.mrb[0].mxu0 }
  0xf6   :  { %160 = vst [vmem:[#allocation2] sm:$0xff] %v151_v18  ;;  %v153_v19 = vpop.f32.mrb[1].mxu0 }
  0xf7   :  { %161 = vst [vmem:[#allocation2 + $0x8] sm:$0xff] %v153_v19  ;;  %v155_v20 = vpop.f32.mrb[2].mxu0 }
  0xf8   :  { %162 = vst [vmem:[#allocation2 + $0x10] sm:$0xff] %v155_v20  ;;  %v157_v21 = vpop.f32.mrb[3].mxu0 }
  0xf9   :  { %163 = vst [vmem:[#allocation2 + $0x18] sm:$0xff] %v157_v21 }
  0xfa   :  { %237 = shalt.err (!%p234_p4)
}
  0xfb   :  { %s238_s18 = scalar_lea.hbm %s334_s2, 512 }
  0xfc   :  { %p239_p5 = scmp.ne.s32.totalorder %s334_s2, %s238_s18  ;;  %p242_p6 = scmp.lt.u32.totalorder %s238_s18, %s334_s2 }
  0xfe   :  { %p244_p7 = pnand %p242_p6, %p239_p5 }
 0x100   :  { %247 = shalt.err (!%p244_p7)
}
 0x101   :  { %s252_s23 = smov 256   ;;  %s253_s24 = smov 16  }
 0x102   :  { %175 = dma.vmem_to_hbm [thread:$0]  %s170_s16, 512, %s334_s2, [#allocation3], %s252_s23, %s252_s23, %s253_s24  }
 0x103   :  { %248 = dma.done.wait [#allocation3], 512  }
 0x104   :  { %249 = vsyncadd [#allocation3], 4294966784 }
 0x105   :  { %179 = vsyncpa [#allocation3], 1 }

// kernel: gpt_forward.2
= control target key start
LH: loop header
LB: loop body
LE: loop exit
PB: predicated region body
PF: predicated region fallthrough
CT: control target
= control target key end

     0   :  { %s4331_s0 = inlined_call_operand.vmem [shape: f32[16,128], index: 0, kind: input, shape index: {}]   ;;  %s4332_s1 = inlined_call_operand.vmem [shape: f32[16,128], index: 1, kind: input, shape index: {}]   ;;  %s4333_s2 = inlined_call_operand.vmem [shape: f32[16,128], index: 2, kind: input, shape index: {}]   ;;  %s4334_s3 = inlined_call_operand.vmem [shape: f32[16,128], index: 3, kind: input, shape index: {}]   ;;  %s4335_s4 = inlined_call_operand.hbm [shape: bf16[2,128,384], index: 4, kind: input, shape index: {}]   ;;  %s4336_s5 = inlined_call_operand.vmem [shape: bf16[2,128,128], index: 5, kind: input, shape index: {}]   ;;  %s4337_s6 = inlined_call_operand.hbm [shape: bf16[2,128,512], index: 6, kind: input, shape index: {}]   ;;  %s4338_s7 = inlined_call_operand.hbm [shape: bf16[2,512,128], index: 7, kind: input, shape index: {}]   ;;  %s4339_s8 = inlined_call_operand.vmem [shape: bf16[16,128], index: 8, kind: output, shape index: {}]  }
   0x1   :  { %4345 = sst [smem:[#allocation14_spill]] %s4337_s6 }
   0x2   :  { %13 = vsyncpa [#allocation5], 0 }
   0x3   :  { %15 = vsyncpa [#allocation5 + $0x1], 0 }
   0x4   :  { %16 = vsyncpa [#allocation7], 0 }
   0x5   :  { %18 = vsyncpa [#allocation7 + $0x1], 0  ;;  %s3689_s27 = smov 0   ;;  %s3691_s28 = smov 0  }
   0x6   :  { %s3693_s29 = smov 0   ;;  %s3695_s30 = smov 0  }
   0x7   :  { %s3697_s9 = smov 0   ;;  %s3699_s10 = smov 0  }
   0x8 LB: > { %4346 = sst [smem:[#allocation11_spill]] %s3621_s9  ;;  %s4340_s11 = sadd.s32 4294967295, %s3625_s10   ;;  %s3625_s10 = sphi %s3699_s10, %s24_s10   ;;  %s3621_s9 = sphi %s3697_s9, %s4362_s9   ;;  %s3617_s30 = sphi %s3695_s30, %s4361_s30   ;;  %s3613_s29 = sphi %s3693_s29, %s4365_s29   ;;  %s3609_s28 = sphi %s3691_s28, %s4364_s28   ;;  %s3605_s27 = sphi %s3689_s27, %s4363_s27  }
   0x9   : > { %s33_s12 = sadd.s32 1, %s3621_s9  ;;  %s132_s13 = sadd.s32 1, %s3613_s29 }
   0xa   : > { %p34_p0 = scmp.ge.s32.totalorder %s33_s12, 2  ;;  %p139_p1 = scmp.ne.s32.totalorder %s3613_s29, %s3609_s28 }
   0xb   : > { %p140_p2 = scmp.eq.s32.totalorder %s3625_s10, 0  ;;  %p145_p4 = scmp.ne.s32.totalorder %s3609_s28, %s3605_s27 }
   0xc   : > { %s4367_s12 = smov (%p34_p0, %s33_s12), 0  ;;  %p146_p5 = scmp.eq.s32.totalorder %s4340_s11, 0 }
   0xd   : > { %4347 = sst [smem:[#allocation12_spill]] %s4367_s12  ;;  %p141_p3 = por %p140_p2, %p139_p1 }
   0xe   : > { %s129_s14 = ssub.s32 %s3621_s9, %s4367_s12  ;;  %p3730_p7 = por %p146_p5, %p145_p4 }
   0xf   : > { %p130_p6 = scmp.eq.s32.totalorder %s129_s14, 0  ;;  %p3220_p8 = scmp.lt.s32.totalorder %s3625_s10, 2 }
  0x10   : > { %s4348_s15 = scalar_select %p3730_p7, 1, 0 }
  0x11   : > { %s3736_s16 = scalar_select %p130_p6, %s3613_s29, %s132_s13  }
  0x12   : > { %s3739_s17 = sand.u32 1, %s3613_s29   ;;  %p3741_p9 = pnand %p3220_p8, %p141_p3 }
  0x13   : > { %4349 = sst [smem:[#allocation13_spill]] %s3736_s16  ;;  %s320_s19 = sand.u32 1, %s3625_s10  }
  0x14   : > { %s4341_s20 = sshll.u32 %s3739_s17, 8  ;;  %s2961_s21 = sshll.u32 %s3621_s9, 12 }
  0x15   : > { %s4351_s6 = sld [smem:[#allocation14_spill]]  ;;  %s324_s25 = scalar_lea.vmem [#allocation6], %s4341_s20 }
  0x16   : > { %s331_s26 = sshll.u32 %s324_s25, 4  ;;  %s3759_s27 = scalar_lea.sflag [#allocation7], %s320_s19  ;;  %s3757_s26 = int_to_ptr.vmem [resolvable:$true] %s331_s26 }
  0x17   : > { %p3765_p11 = pneg %p3741_p9 }
  0x1b   : > { %s3753_s24 = scalar_lea.hbm %s4351_s6, %s2961_s21  ;;  %s3486_s11 = scalar_lea.hbm %s4351_s6, 8192 }
  0x1c   : > { %s3481_s13 = scalar_lea.hbm %s3753_s24, 4096  ;;  %p3487_p0 = scmp.lt.u32.totalorder %s3753_s24, %s4351_s6 }
  0x1d   : > { %p3482_p10 = scmp.ne.s32.totalorder %s3753_s24, %s3481_s13  ;;  %p3488_p1 = scmp.lt.u32.totalorder %s3486_s11, %s3481_s13 }
  0x1e   : > { %p3490_p3 = scmp.lt.u32.totalorder %s3481_s13, %s3753_s24 }
  0x1f   : > { %p3484_p12 = pnand %p3765_p11, %p3482_p10  ;;  %p3489_p2 = por %p3488_p1, %p3487_p0 }
  0x21   : > { %p3485_p13 = pneg %p3484_p12  ;;  %p3491_p4 = por %p3490_p3, %p3489_p2 }
  0x23   : > { %p3492_p5 = pnand %p3491_p4, %p3485_p13 }
  0x25   : > { %3495 = shalt.err (!%p3492_p5)
}
  0x26   : > { %s3496_s19 = scalar_lea.vmem %s3757_s26, 4096  ;;  %s3627_s22 = smov [#allocation6]  }
  0x27   : > { %p3497_p6 = scmp.ne.s32.totalorder %s3757_s26, %s3496_s19  ;;  %s3501_s23 = sshll.u32 %s3627_s22, 4  ;;  %s3502_s23 = int_to_ptr.vmem [resolvable:$false] %s3501_s23 }
  0x28   : > { %s3503_s20 = scalar_lea.vmem %s3502_s23, 8192  ;;  %p3504_p12 = scmp.lt.s32.totalorder %s3757_s26, %s3502_s23 }
  0x29   : > { %p3499_p8 = pnand %p3497_p6, %p3765_p11  ;;  %p3505_p7 = scmp.lt.s32.totalorder %s3503_s20, %s3496_s19 }
  0x2b   : > { %p3500_p10 = pneg %p3499_p8  ;;  %p3506_p0 = por %p3505_p7, %p3504_p12 }
  0x2d   : > { %p3507_p1 = pnand %p3506_p0, %p3500_p10 }
  0x2f   : > { %3510 = shalt.err (!%p3507_p1)
}
  0x30   : > { %s3628_s11 = smov 256   ;;  %s3629_s13 = smov 16  }
  0x31   : > { %3216 = dma.hbm_to_vmem [thread:$0]  (!%p3741_p9), %s3753_s24, 4096, %s3757_s26, %s3759_s27, %s3628_s11, %s3628_s11, %s3629_s13  }
  0x32   : > { %s3794_s22 = scalar_lea.hbm %s4338_s7, %s2961_s21  ;;  %s4353_s23 = sshll.u32 %s3739_s17, 8 }
  0x33   : > { %s345_s20 = scalar_lea.vmem [#allocation8], %s4353_s23  ;;  %p2836_p7 = scmp.ge.s32.totalorder %s3625_s10, 1 }
  0x34   : > { %s352_s6 = sshll.u32 %s345_s20, 4  ;;  %p360_p13 = scmp.lt.s32.totalorder %s3625_s10, 3  ;;  %s3798_s6 = int_to_ptr.vmem [resolvable:$true] %s352_s6 }
  0x35   : > { %s3201_s16 = smul.u32 192, %s3739_s17  ;;  %s292_s19 = scalar_lea.sflag [#allocation5], %s3739_s17 }
  0x36   : > { %p3802_p2 = pnand %p2836_p7, %p360_p13  ;;  %s3202_s24 = smul.u32 3072, %s3621_s9 }
  0x37   : > { %s295_s21 = scalar_lea.vmem [#allocation4], %s3201_s16  ;;  %s3516_s26 = scalar_lea.hbm %s4335_s4, 6144 }
  0x38   : > { %s4354_s12 = scalar_select %p3802_p2, 1, 0 }
  0x39   : > { %s3811_s13 = scalar_lea.hbm %s4335_s4, %s3202_s24  ;;  %s302_s25 = sshll.u32 %s295_s21, 4  ;;  %s3813_s25 = int_to_ptr.vmem [resolvable:$true] %s302_s25 }
  0x3a   : > { %s3511_s23 = scalar_lea.hbm %s3811_s13, 3072  ;;  %p3517_p6 = scmp.lt.u32.totalorder %s3811_s13, %s4335_s4 }
  0x3b   : > { %p3512_p3 = scmp.ne.s32.totalorder %s3811_s13, %s3511_s23  ;;  %p3518_p8 = scmp.lt.u32.totalorder %s3516_s26, %s3511_s23 }
  0x3c   : > { %p3520_p12 = scmp.lt.u32.totalorder %s3511_s23, %s3811_s13 }
  0x3d   : > { %p3514_p4 = pnand %p3512_p3, %p3765_p11  ;;  %p3519_p10 = por %p3518_p8, %p3517_p6 }
  0x3f   : > { %p3515_p5 = pneg %p3514_p4  ;;  %p3521_p0 = por %p3520_p12, %p3519_p10 }
  0x41   : > { %p3522_p1 = pnand %p3521_p0, %p3515_p5 }
  0x43   : > { %3525 = shalt.err (!%p3522_p1)
}
  0x44   : > { %s3526_s16 = scalar_lea.vmem %s3813_s25, 3072  ;;  %s3630_s9 = smov [#allocation4]  }
  0x45   : > { %p3527_p7 = scmp.ne.s32.totalorder %s3813_s25, %s3526_s16  ;;  %s3531_s21 = sshll.u32 %s3630_s9, 4  ;;  %s3532_s21 = int_to_ptr.vmem [resolvable:$false] %s3531_s21 }
  0x46   : > { %s3533_s20 = scalar_lea.vmem %s3532_s21, 6144  ;;  %p3534_p4 = scmp.lt.s32.totalorder %s3813_s25, %s3532_s21 }
  0x47   : > { %p3529_p13 = pnand %p3527_p7, %p3765_p11  ;;  %p3535_p2 = scmp.lt.s32.totalorder %s3533_s20, %s3526_s16 }
  0x49   : > { %p3530_p3 = pneg %p3529_p13  ;;  %p3536_p6 = por %p3535_p2, %p3534_p4 }
  0x4b   : > { %p3537_p8 = pnand %p3536_p6, %p3530_p3 }
  0x4d   : > { %3540 = shalt.err (!%p3537_p8)
}
  0x4e   : > { %s3631_s23 = smov 192   ;;  %s3632_s26 = smov 12  }
  0x4f   : > { %3213 = dma.hbm_to_vmem [thread:$0]  (!%p3741_p9), %s3811_s13, 3072, %s3813_s25, %s292_s19, %s3631_s23, %s3631_s23, %s3632_s26  }
  0x50   : > { %s3541_s24 = scalar_lea.hbm %s3794_s22, 4096  ;;  %s3546_s9 = scalar_lea.hbm %s4338_s7, 8192 }
  0x51   : > { %p3542_p5 = scmp.ne.s32.totalorder %s3794_s22, %s3541_s24  ;;  %p3547_p12 = scmp.lt.u32.totalorder %s3794_s22, %s4338_s7 }
  0x52   : > { %p3548_p0 = scmp.lt.u32.totalorder %s3546_s9, %s3541_s24  ;;  %p3550_p7 = scmp.lt.u32.totalorder %s3541_s24, %s3794_s22 }
  0x53   : > { %p3544_p2 = pnand %p3542_p5, %p3765_p11 }
  0x54   : > { %p3549_p1 = por %p3548_p0, %p3547_p12 }
  0x55   : > { %p3545_p10 = pneg %p3544_p2 }
  0x56   : > { %p3551_p13 = por %p3550_p7, %p3549_p1 }
  0x58   : > { %p3552_p3 = pnand %p3551_p13, %p3545_p10 }
  0x5a   : > { %3555 = shalt.err (!%p3552_p3)
}
  0x5b   : > { %s3556_s17 = scalar_lea.vmem %s3798_s6, 4096  ;;  %s3633_s13 = smov [#allocation8]  }
  0x5c   : > { %p3557_p4 = scmp.ne.s32.totalorder %s3798_s6, %s3556_s17  ;;  %s3561_s25 = sshll.u32 %s3633_s13, 4  ;;  %s3562_s25 = int_to_ptr.vmem [resolvable:$false] %s3561_s25 }
  0x5d   : > { %s3563_s19 = scalar_lea.vmem %s3562_s25, 8192  ;;  %p3564_p5 = scmp.lt.s32.totalorder %s3798_s6, %s3562_s25 }
  0x5e   : > { %p3559_p6 = pnand %p3557_p4, %p3765_p11  ;;  %p3565_p2 = scmp.lt.s32.totalorder %s3563_s19, %s3556_s17 }
  0x60   : > { %p3560_p8 = pneg %p3559_p6  ;;  %p3566_p12 = por %p3565_p2, %p3564_p5 }
  0x62   : > { %p3567_p0 = pnand %p3566_p12, %p3560_p8 }
  0x64   : > { %3570 = shalt.err (!%p3567_p0)
}
  0x65   : > { %s3634_s23 = smov 64   ;;  %s3635_s26 = smov 4  }
  0x66   : > { %3219 = dma.hbm_to_vmem [thread:$0]  (!%p3741_p9), %s3794_s22, 4096, %s3798_s6, %s3759_s27, %s3634_s23, %s3634_s23, %s3635_s26  }
  0x67   : > { %p4355_p11 = scmp.ne.s32.totalorder %s4354_s12, 0 }
  0x68   : > { %s366_s14 = sand.u32 (!%p4355_p11), 1, %s3609_s28   ;;  %p4356_p10 = scmp.ne.s32.totalorder (!%p4355_p11), %s4348_s15, 0 }
  0x69   : > { %364 = sbr.rel (%p4355_p11) target bundleno = 4282 (0x10ba), region = 52  ;;  %s367_s11 = scalar_lea.sflag (!%p4355_p11), [#allocation5], %s366_s14 }
  0x6a   : > { %s3203_s24 = smul.u32 (!%p4355_p11), 192, %s366_s14 }
  0x6c   : > { %s3864_s16 = scalar_lea.vmem (!%p4355_p11), [#allocation4], %s3203_s24 }
  0x70   : > { %3596 = dma.done.wait (%p4356_p10), %s367_s11, 3072  }
  0x71   : > { %3598 = vsyncadd (%p4356_p10), %s367_s11, 4294964224  ;;  %s4357_s9 = sadd.s32 4294967295, %s3625_s10   ;;  %s2837_s6 = sshll.u32 %s366_s14, 8 }
  0x72   : > { %s375_s18 = sand.u32 1, %s4357_s9   ;;  %s3872_s12 = scalar_lea.vmem [#allocation6], %s2837_s6 }
  0x73   : > { %s376_s27 = scalar_lea.sflag [#allocation7], %s375_s18 }
  0x74   : > { %3600 = dma.done.wait (%p4356_p10), %s376_s27, 8192  }
  0x75   : > { %3602 = vsyncadd (%p4356_p10), %s376_s27, 4294959104  ;;  %p447_p9 = scmp.lt.s32.totalorder %s3617_s30, 1  ;;  %s3885_s25 = scalar_lea.vmem [#allocation8], %s2837_s6 }
  0x76   : > { %p2841_p1 = scmp.ne.s32.totalorder %s3617_s30, 0 }
  0x77   : > { %s448_s22 = scalar_select %p447_p9, %s3617_s30, 1 }
  0x78   : > { %462 = sbr.rel (%p2841_p1) target bundleno = 127 (0x7f), region = 68  ;;  %v463_v0 = vld [vmem:[%s4331_s0] sm:$0xff] (!%p2841_p1)  ;;  %v464_v1 = vld [vmem:[%s4331_s0 + $0x8] sm:$0xff] (!%p2841_p1) }
  0x79   : > { %s2963_s21 = sshll.u32 %s448_s22, 6  ;;  %465 = vst [vmem:[#allocation2] sm:$0xff] (!%p2841_p1), %v463_v0  ;;  %466 = vst [vmem:[#allocation2 + $0x8] sm:$0xff] (!%p2841_p1), %v464_v1 }
  0x7a   : > { %s3883_s13 = scalar_lea.vmem %s4336_s5, %s2963_s21 }
  0x7f PF: > { %v3283_v5 = vld [vmem:[%s3864_s16 + $0x4] ss:$12 sps:$4 sm:$0xff]   ;;  %v3636_v6 = vmov 0.0   ;;  %v3285_v7 = vld [vmem:[%s3864_s16] ss:$12 sps:$4 sm:$0xff]   ;;  %v3637_v31 = vmov 0  }
  0x80   : > { %v3894_v2 = vld [vmem:[#allocation2] sm:$0xff]  ;;  %v3896_v3 = vld [vmem:[#allocation2 + $0x8] sm:$0xff]  ;;  %3065 = vmatprep.subr.bf16.mxu1 %v3636_v6  ;;  %645 = vmatprep.subr.bf16.mxu0 %v3283_v5  ;;  %v3293_v14 = vld [vmem:[%s3864_s16 + $0x30] ss:$12 sps:$4 sm:$0xff]   ;;  %vm3638_vm0 = vmmov 0   ;;  %s3639_s14 = smov 1  }
  0x81   : > { %v469_v4 = vmul.f32 %v3894_v2, %v3894_v2  ;;  %v3286_v8 = vld [vmem:[%s3864_s16 + $0x8] ss:$12 sps:$4 sm:$0xff]   ;;  %v470_v9 = vmul.f32 %v3896_v3, %v3896_v3  ;;  %646 = vmatpush1.bf16.msra.mxu0 %v3285_v7  ;;  %v3289_v11 = vld [vmem:[%s3864_s16 + $0x18] ss:$12 sps:$4 sm:$0xff]   ;;  %v3290_v12 = vld [vmem:[%s3864_s16 + $0x20] ss:$12 sps:$4 sm:$0xff]   ;;  %677 = vmatprep.mubr.bf16.mxu0 %v3637_v31 }
  0x82   : > { %v3287_v10 = vld [vmem:[%s3864_s16 + $0x1c] ss:$12 sps:$4 sm:$0xff]   ;;  %3066 = vmatpush3.bf16.msra.mxu1 %v3286_v8  ;;  %v3291_v13 = vld [vmem:[%s3864_s16 + $0x34] ss:$12 sps:$4 sm:$0xff]   ;;  %v3294_v15 = vld [vmem:[%s3864_s16 + $0x38] ss:$12 sps:$4 sm:$0xff]   ;;  %3081 = vmatprep.mubr.msk.bf16.mxu1 %vm3638_vm0, %v3636_v6 }
  0x83   : > { %471 = vadd.xlane.f32.xlu0 %v469_v4  ;;  %647 = vmatprep.subr.bf16.mxu0 %v3287_v10  ;;  %v3295_v16 = vld [vmem:[%s3864_s16 + $0x4c] ss:$12 sps:$4 sm:$0xff]   ;;  %v3297_v17 = vld [vmem:[%s3864_s16 + $0x48] ss:$12 sps:$4 sm:$0xff]   ;;  %v3298_v18 = vld [vmem:[%s3864_s16 + $0x50] ss:$12 sps:$4 sm:$0xff]  }
  0x84   : > { %3067 = vmatprep.subr.bf16.mxu1 %v3636_v6  ;;  %v3299_v19 = vld [vmem:[%s3864_s16 + $0x64] ss:$12 sps:$4 sm:$0xff]   ;;  %v3301_v20 = vld [vmem:[%s3864_s16 + $0x60] ss:$12 sps:$4 sm:$0xff]   ;;  %v3302_v21 = vld [vmem:[%s3864_s16 + $0x68] ss:$12 sps:$4 sm:$0xff]  }
  0x85   : > { %648 = vmatpush1.bf16.msra.mxu0 %v3289_v11  ;;  %v3303_v22 = vld [vmem:[%s3864_s16 + $0x7c] ss:$12 sps:$4 sm:$0xff]   ;;  %v3305_v23 = vld [vmem:[%s3864_s16 + $0x78] ss:$12 sps:$4 sm:$0xff]   ;;  %v3306_v24 = vld [vmem:[%s3864_s16 + $0x80] ss:$12 sps:$4 sm:$0xff]  }
  0x86   : > { %3068 = vmatpush3.bf16.msra.mxu1 %v3290_v12  ;;  %649 = vmatprep.subr.bf16.mxu0 %v3291_v13  ;;  %v3307_v25 = vld [vmem:[%s3864_s16 + $0x94] ss:$12 sps:$4 sm:$0xff]   ;;  %v3309_v26 = vld [vmem:[%s3864_s16 + $0x90] ss:$12 sps:$4 sm:$0xff]   ;;  %v3310_v27 = vld [vmem:[%s3864_s16 + $0x98] ss:$12 sps:$4 sm:$0xff]  }
  0x87   : > { %473 = vadd.xlane.f32.xlu0 %v470_v9  ;;  %3069 = vmatprep.subr.bf16.mxu1 %v3636_v6  ;;  %v3311_v28 = vld [vmem:[%s3864_s16 + $0xac] ss:$12 sps:$4 sm:$0xff]   ;;  %v3313_v29 = vld [vmem:[%s3864_s16 + $0xa8] ss:$12 sps:$4 sm:$0xff]   ;;  %v3314_v30 = vld [vmem:[%s3864_s16 + $0xb0] ss:$12 sps:$4 sm:$0xff]  }
  0x88   : > { %s3640_s24 = smov 127   ;;  %v729_v51 = vld [vmem:[%s4332_s1] sm:$0xff]  ;;  %vm778_vm1 = vcmask 261120   ;;  %v732_v5 = vld [vmem:[%s4333_s2 + $0x8] sm:$0xff]  ;;  %s3641_s15 = smov 96   ;;  %vm942_vm2 = vcmask 1043456  }
  0x89   : > { %650 = vmatpush1.bf16.msra.mxu0 %v3293_v14  ;;  %v731_v52 = vld [vmem:[%s4333_s2] sm:$0xff]  ;;  %v730_v8 = vld [vmem:[%s4332_s1 + $0x8] sm:$0xff]  ;;  %vm912_vm4 = vcmask 64512   ;;  %s3642_s26 = smov 64   ;;  %vm1320_vm5 = vcmask 523520   ;;  %vm1603_vm6 = vcmask 785920  }
  0x8a   : > { %3070 = vmatpush3.bf16.msra.mxu1 %v3294_v15  ;;  %651 = vmatprep.subr.bf16.mxu0 %v3295_v16  ;;  %v733_v53 = vld [vmem:[%s4334_s3] sm:$0xff]  ;;  %v734_v12 = vld [vmem:[%s4334_s3 + $0x8] sm:$0xff]  ;;  %vm1886_vm7 = vcmask 1048320   ;;  %p2954_p7 = scmp.ne.s32.totalorder %s3617_s30, 1 }
  0x8b   : > { %3071 = vmatprep.subr.bf16.mxu1 %v3636_v6 }
  0x8d   : > { %652 = vmatpush1.bf16.msra.mxu0 %v3297_v17 }
  0x8e   : > { %3072 = vmatpush3.bf16.msra.mxu1 %v3298_v18  ;;  %653 = vmatprep.subr.bf16.mxu0 %v3299_v19 }
  0x8f   : > { %3073 = vmatprep.subr.bf16.mxu1 %v3636_v6 }
  0x91   : > { %654 = vmatpush1.bf16.msra.mxu0 %v3301_v20 }
  0x92   : > { %3074 = vmatpush3.bf16.msra.mxu1 %v3302_v21  ;;  %655 = vmatprep.subr.bf16.mxu0 %v3303_v22 }
  0x93   : > { %3075 = vmatprep.subr.bf16.mxu1 %v3636_v6 }
  0x95   : > { %656 = vmatpush1.bf16.msra.mxu0 %v3305_v23 }
  0x96   : > { %3076 = vmatpush3.bf16.msra.mxu1 %v3306_v24  ;;  %657 = vmatprep.subr.bf16.mxu0 %v3307_v25 }
  0x97   : > { %3077 = vmatprep.subr.bf16.mxu1 %v3636_v6 }
  0x99   : > { %658 = vmatpush1.bf16.msra.mxu0 %v3309_v26 }
  0x9a   : > { %3078 = vmatpush3.bf16.msra.mxu1 %v3310_v27  ;;  %659 = vmatprep.subr.bf16.mxu0 %v3311_v28 }
  0x9b   : > { %3079 = vmatprep.subr.bf16.mxu1 %v3636_v6 }
  0x9d   : > { %660 = vmatpush1.bf16.msra.mxu0 %v3313_v29 }
  0x9e   : > { %3080 = vmatpush3.bf16.msra.mxu1 %v3314_v30  ;;  %3109 = vmatprep.subr.bf16.mxu0 %v3636_v6 }
  0x9f   : > { %3085 = vmatprep.subr.bf16.mxu1 %v3636_v6 }
 0x110   : > { %v472_v32 = vpop.xlane.xlu0 %471 }
 0x111   : > { %v476_v33 = vmul.f32 0.0078125, %v472_v32 }
 0x113   : > { %v478_v34 = vadd.f32 1.1920929e-07, %v476_v33 }
 0x114   : > { %v474_v35 = vpop.xlane.xlu0 %473 }
 0x115   : > { %v477_v36 = vmul.f32 0.0078125, %v474_v35  ;;  %3403 = vrsqrt.f32 %v478_v34 }
 0x117   : > { %v479_v37 = vadd.f32 1.1920929e-07, %v477_v36 }
 0x119   : > { %3405 = vrsqrt.f32 %v479_v37 }
 0x11f   : > { %v3404_v38 = vpop.eup %3403 }
 0x120   : > { %v482_v40 = vmul.f32 %v3404_v38, %v3894_v2 }
 0x123   : > { %v3406_v39 = vpop.eup %3405 }
 0x124   : > { %v483_v41 = vmul.f32 %v3406_v39, %v3896_v3 }
 0x126   : > { %v484_v42 = vpack.c.bf16 %v483_v41, %v482_v40 }
 0x128   : > { %678 = vmatmul.mubr.bf16.vlgmr.msra.gmra.mrb[0].mxu0 %v484_v42  ;;  %3082 = vmatmul.mubr.bf16.vlgmr.msra.gmra.mrb[0].mxu1 %v484_v42 }
 0x129   : > { %3087 = vmatprep.mubr.msk.bf16.mxu1 %vm3638_vm0, %v3636_v6  ;;  %3111 = vmatprep.mubr.msk.bf16.mxu0 %vm3638_vm0, %v3636_v6 }
 0x1fb   : > { %v679_v43 = vpop.f32.mrb[0].mxu0  ;;  %v3945_v44 = vpop.f32.mrb[0].mxu1 }
 0x1fc   : > { %v3083_v45 = vpop.f32.mrb[1].mxu1  ;;  %745 = vrot.lane.b32.xlu1 %v679_v43, %s3639_s14  ;;  %737 = vrot.lane.b32.xlu0 %v679_v43, %s3640_s24  ;;  %v681_v46 = vpop.f32.mrb[1].mxu0  ;;  %v735_v56 = vmul.f32 %v729_v51, %v679_v43 }
 0x1fd   : > { %v683_v47 = vpop.f32.mrb[2].mxu0  ;;  %v3947_v48 = vpop.f32.mrb[2].mxu1  ;;  %v753_v63 = vmul.f32 %v729_v51, %v681_v46 }
 0x1fe   : > { %v685_v49 = vpop.f32.mrb[3].mxu0  ;;  %v3084_v50 = vpop.f32.mrb[3].mxu1  ;;  %v736_v22 = vmul.f32 %v730_v8, %v683_v47 }
 0x1ff   : > { %v754_v13 = vmul.f32 %v730_v8, %v685_v49 }
 0x200   : > { %755 = vrot.lane.b32.xlu1 %v681_v46, %s3640_s24 }
 0x204   : > { %763 = vrot.lane.b32.xlu1 %v681_v46, %s3639_s14 }
 0x208   : > { %757 = vrot.lane.b32.xlu1 %v685_v49, %s3640_s24 }
 0x20c   : > { %765 = vrot.lane.b32.xlu1 %v685_v49, %s3639_s14 }
 0x210   : > { %739 = vrot.lane.b32.xlu1 %v683_v47, %s3640_s24 }
 0x214   : > { %747 = vrot.lane.b32.xlu1 %v683_v47, %s3639_s14  ;;  %s3643_s14 = smov 32  }
 0x26e   : > { %v746_v54 = vpop.permute.xlu1 %745  ;;  %v738_v55 = vpop.permute.xlu0 %737 }
 0x26f   : > { %v741_v57 = vmul.f32 %v738_v55, %v731_v52  ;;  %v749_v58 = vmul.f32 %v746_v54, %v733_v53 }
 0x271   : > { %v743_v59 = vadd.f32 %v741_v57, %v735_v56 }
 0x272   : > { %v756_v60 = vpop.permute.xlu1 %755 }
 0x273   : > { %v3958_v61 = vadd.f32 %v749_v58, %v743_v59  ;;  %v759_v62 = vmul.f32 %v756_v60, %v731_v52  ;;  %v4019_v59 = vpack.c.bf16 %v3945_v44, %v3945_v44 }
 0x275   : > { %v3962_v0 = vmul.f32 %v3958_v61, %v3958_v61  ;;  %v761_v2 = vadd.f32 %v759_v62, %v753_v63  ;;  %v944_v63 = vsel %vm942_vm2, %v4019_v59, 0 }
 0x276   : > { %v764_v1 = vpop.permute.xlu1 %763 }
 0x277   : > { %v767_v3 = vmul.f32 %v764_v1, %v733_v53  ;;  %v779_v4 = vsel %vm778_vm1, %v3962_v0, 0.0  ;;  %v771_v1 = vlaneseq }
 0x278   : > { %780 = vadd.xlane.f32.xlu0 %v779_v4 }
 0x279   : > { %v3969_v7 = vadd.f32 %v767_v3, %v761_v2  ;;  %v772_v2 = vshrl.u32 %v771_v1, 7  ;;  %v774_v3 = vand.u32 127, %v771_v1 }
 0x27a   : > { %v758_v9 = vpop.permute.xlu1 %757 }
 0x27b   : > { %v760_v10 = vmul.f32 %v758_v9, %v732_v5  ;;  %v3976_v11 = vmul.f32 %v3969_v7, %v3969_v7  ;;  %vm4028_vm3 = vcmp.le.s32.totalorder %v774_v3, %v772_v2 }
 0x27d   : > { %v798_v14 = vsel %vm778_vm1, %v3976_v11, 0.0  ;;  %v762_v16 = vadd.f32 %v760_v10, %v754_v13 }
 0x27e   : > { %799 = vadd.xlane.f32.xlu1 %v798_v14  ;;  %v766_v15 = vpop.permute.xlu1 %765 }
 0x27f   : > { %v768_v17 = vmul.f32 %v766_v15, %v734_v12 }
 0x281   : > { %v3983_v18 = vadd.f32 %v768_v17, %v762_v16 }
 0x282   : > { %v740_v19 = vpop.permute.xlu1 %739 }
 0x283   : > { %v742_v20 = vmul.f32 %v740_v19, %v732_v5  ;;  %v3987_v21 = vmul.f32 %v3983_v18, %v3983_v18 }
 0x285   : > { %v801_v23 = vsel %vm778_vm1, %v3987_v21, 0.0  ;;  %v744_v25 = vadd.f32 %v742_v20, %v736_v22 }
 0x286   : > { %v748_v24 = vpop.permute.xlu1 %747  ;;  %802 = vadd.xlane.f32.xlu0 %v801_v23 }
 0x287   : > { %v750_v26 = vmul.f32 %v748_v24, %v734_v12 }
 0x289   : > { %v3991_v27 = vadd.f32 %v750_v26, %v744_v25 }
 0x28b   : > { %v3995_v28 = vmul.f32 %v3991_v27, %v3991_v27 }
 0x28d   : > { %v782_v29 = vsel %vm778_vm1, %v3995_v28, 0.0 }
 0x28e   : > { %783 = vadd.xlane.f32.xlu1 %v782_v29 }
 0x29c   : > { %1060 = vrot.lane.b32.xlu0 %v3976_v11, %s3641_s15 }
 0x29f   : > { %1062 = vrot.lane.b32.xlu1 %v3987_v21, %s3641_s15 }
 0x2a0   : > { %1038 = vrot.lane.b32.xlu0 %v3995_v28, %s3641_s15 }
 0x2a3   : > { %1036 = vrot.lane.b32.xlu1 %v3962_v0, %s3641_s15 }
 0x305   : > { %v781_v30 = vpop.xlane.xlu0 %780 }
 0x306   : > { %v786_v32 = vmul.f32 0.03125, %v781_v30 }
 0x308   : > { %v788_v33 = vadd.f32 1.1920929e-07, %v786_v32 }
 0x30a   : > { %3407 = vrsqrt.f32 %v788_v33 }
 0x30b   : > { %v800_v34 = vpop.xlane.xlu1 %799 }
 0x30c   : > { %v804_v35 = vmul.f32 0.03125, %v800_v34 }
 0x30e   : > { %v806_v36 = vadd.f32 1.1920929e-07, %v804_v35 }
 0x310   : > { %3409 = vrsqrt.f32 %v806_v36 }
 0x313   : > { %v803_v37 = vpop.xlane.xlu0 %802 }
 0x314   : > { %v805_v38 = vmul.f32 0.03125, %v803_v37  ;;  %v3408_v40 = vpop.eup %3407 }
 0x315   : > { %v792_v46 = vmul.f32 0.17677669, %v3408_v40 }
 0x316   : > { %v807_v39 = vadd.f32 1.1920929e-07, %v805_v38 }
 0x317   : > { %v794_v51 = vmul.f32 %v792_v46, %v3958_v61  ;;  %v1061_v5 = vpop.permute.xlu0 %1060 }
 0x318   : > { %3411 = vrsqrt.f32 %v807_v39  ;;  %v1066_v26 = vsel %vm778_vm1, %v1061_v5, 0.0 }
 0x319   : > { %v812_v54 = vpack.c.bf16 %v794_v51, %v794_v51 }
 0x31a   : > { %v3410_v41 = vpop.eup %3409 }
 0x31b   : > { %v784_v42 = vpop.xlane.xlu1 %783  ;;  %v810_v43 = vmul.f32 %v3410_v41, %v3969_v7  ;;  %v1039_v16 = vpop.permute.xlu0 %1038 }
 0x31c   : > { %v787_v45 = vmul.f32 0.03125, %v784_v42  ;;  %v1045_v19 = vsel %vm778_vm1, %v1039_v16, 0.0 }
 0x31d   : > { %v814_v47 = vpack.c.bf16 %v810_v43, %v810_v43 }
 0x31e   : > { %v789_v49 = vadd.f32 1.1920929e-07, %v787_v45 }
 0x31f   : > { %v820_v50 = vsel %vm778_vm1, %v814_v47, 0  ;;  %v1063_v13 = vpop.permute.xlu1 %1062 }
 0x320   : > { %3413 = vrsqrt.f32 %v789_v49  ;;  %3086 = vmatpush3.bf16.xpose.msra.mxu1 %v820_v50  ;;  %v1069_v15 = vsel %vm778_vm1, %v1063_v13, 0.0 }
 0x321   : > { %3091 = vmatprep.subr.bf16.mxu1 %v3636_v6 }
 0x322   : > { %v3412_v52 = vpop.eup %3411 }
 0x323   : > { %v811_v53 = vmul.f32 %v3412_v52, %v3983_v18  ;;  %v1037_v29 = vpop.permute.xlu1 %1036 }
 0x324   : > { %v1042_v30 = vsel %vm778_vm1, %v1037_v29, 0.0 }
 0x325   : > { %v815_v55 = vpack.c.bf16 %v811_v53, %v811_v53 }
 0x327   : > { %3088 = vmatmul.mubr.msk.bf16.vlgmr.msra.gmra.mrb[4].mxu1 %vm778_vm1, %v812_v54  ;;  %v866_v56 = vsel %vm778_vm1, %v815_v55, 0 }
 0x328   : > { %3092 = vmatpush3.bf16.xpose.msra.mxu1 %v866_v56  ;;  %3093 = vmatprep.mubr.msk.bf16.mxu1 %vm3638_vm0, %v3636_v6 }
 0x329   : > { %3097 = vmatprep.subr.bf16.mxu1 %v3636_v6 }
 0x32a   : > { %v3414_v57 = vpop.eup %3413 }
 0x32b   : > { %v793_v58 = vmul.f32 0.17677669, %v3414_v57 }
 0x32d   : > { %v795_v60 = vmul.f32 %v793_v58, %v3991_v27 }
 0x32f   : > { %v813_v62 = vpack.c.bf16 %v795_v60, %v795_v60 }
 0x331   : > { %3094 = vmatmul.mubr.msk.bf16.vlgmr.msra.gmra.mrb[8].mxu1 %vm778_vm1, %v813_v62 }
 0x332   : > { %3098 = vmatpush3.bf16.msra.mxu1 %v944_v63  ;;  %3099 = vmatprep.mubr.msk.bf16.mxu1 %vm3638_vm0, %v3636_v6 }
 0x333   : > { %3103 = vmatprep.subr.bf16.mxu1 %v3636_v6 }
 0x3fa   : > { %v856_v4 = vpop.f32.mrb[4].mxu1 }
 0x3fb   : > { %v910_v8 = vsel %vm4028_vm3, %v856_v4, -1e+30  ;;  %v3089_v9 = vpop.f32.mrb[5].mxu1 }
 0x3fc   : > { %v859_v10 = vpop.f32.mrb[6].mxu1  ;;  %v913_v12 = vsel %vm912_vm4, %v910_v8, -inf }
 0x3fd   : > { %v3090_v14 = vpop.f32.mrb[7].mxu1  ;;  %914 = vmax.xlane.f32.xlu1 %v913_v12 }
 0x401   : > { %1070 = vadd.xlane.f32.xlu1 %v1069_v15 }
 0x404   : > { %v902_v17 = vpop.f32.mrb[8].mxu1 }
 0x405   : > { %v911_v20 = vsel %vm4028_vm3, %v902_v17, -1e+30  ;;  %v3095_v22 = vpop.f32.mrb[9].mxu1  ;;  %1046 = vadd.xlane.f32.xlu1 %v1045_v19  ;;  %v4064_v17 = vpack.c.bf16 %v3947_v48, %v3947_v48 }
 0x406   : > { %v905_v23 = vpop.f32.mrb[10].mxu1  ;;  %v916_v24 = vsel %vm912_vm4, %v911_v20, -inf }
 0x407   : > { %917 = vmax.xlane.f32.xlu0 %v916_v24  ;;  %v3096_v25 = vpop.f32.mrb[11].mxu1  ;;  %v990_v23 = vsel %vm942_vm2, %v4064_v17, 0 }
 0x40b   : > { %1067 = vadd.xlane.f32.xlu0 %v1066_v26 }
 0x40f   : > { %1043 = vadd.xlane.f32.xlu0 %v1042_v30 }
 0x48a   : > { %v915_v32 = vpop.xlane.xlu1 %914 }
 0x48b   : > { %v919_v33 = vsub.f32 %v910_v8, %v915_v32 }
 0x48d   : > { %v921_v34 = vmul.f32 1.442695, %v919_v33 }
 0x48e   : > { %v1071_v35 = vpop.xlane.xlu1 %1070 }
 0x48f   : > { %3415 = vpow2.f32 %v921_v34  ;;  %v1073_v46 = vmul.f32 0.03125, %v1071_v35 }
 0x491   : > { %v1075_v52 = vadd.f32 1.1920929e-07, %v1073_v46 }
 0x492   : > { %v1047_v36 = vpop.xlane.xlu1 %1046 }
 0x493   : > { %v1049_v38 = vmul.f32 0.03125, %v1047_v36 }
 0x494   : > { %v918_v37 = vpop.xlane.xlu0 %917 }
 0x495   : > { %v920_v39 = vsub.f32 %v911_v20, %v918_v37  ;;  %v1051_v43 = vadd.f32 1.1920929e-07, %v1049_v38 }
 0x497   : > { %v923_v40 = vmul.f32 1.442695, %v920_v39 }
 0x498   : > { %v1068_v41 = vpop.xlane.xlu0 %1067 }
 0x499   : > { %v3416_v42 = vpop.eup %3415  ;;  %3417 = vpow2.f32 %v923_v40  ;;  %v1072_v45 = vmul.f32 0.03125, %v1068_v41 }
 0x49a   : > { %v925_v47 = vsel %vm912_vm4, %v3416_v42, 0.0  ;;  %3419 = vrsqrt.f32 %v1051_v43 }
 0x49b   : > { %v1074_v49 = vadd.f32 1.1920929e-07, %v1072_v45  ;;  %926 = vadd.xlane.f32.xlu0 %v925_v47 }
 0x49c   : > { %v1044_v50 = vpop.xlane.xlu0 %1043 }
 0x49d   : > { %v1048_v51 = vmul.f32 0.03125, %v1044_v50  ;;  %3421 = vrsqrt.f32 %v1074_v49 }
 0x49e   : > { %3423 = vrsqrt.f32 %v1075_v52 }
 0x49f   : > { %v1050_v53 = vadd.f32 1.1920929e-07, %v1048_v51 }
 0x4a1   : > { %3425 = vrsqrt.f32 %v1050_v53 }
 0x4a3   : > { %v3418_v54 = vpop.eup %3417 }
 0x4a4   : > { %v928_v55 = vsel %vm912_vm4, %v3418_v54, 0.0  ;;  %v3420_v56 = vpop.eup %3419 }
 0x4a5   : > { %929 = vadd.xlane.f32.xlu1 %v928_v55  ;;  %v1055_v58 = vmul.f32 0.17677669, %v3420_v56 }
 0x4a7   : > { %v3422_v57 = vpop.eup %3421  ;;  %v1057_v2 = vmul.f32 %v1055_v58, %v3991_v27 }
 0x4a8   : > { %v1078_v60 = vmul.f32 %v3422_v57, %v3969_v7  ;;  %v3424_v62 = vpop.eup %3423 }
 0x4a9   : > { %v1079_v4 = vmul.f32 %v3424_v62, %v3983_v18  ;;  %v1081_v5 = vpack.c.bf16 %v1057_v2, %v1057_v2 }
 0x4aa   : > { %v1082_v1 = vpack.c.bf16 %v1078_v60, %v1078_v60 }
 0x4ab   : > { %v3426_v63 = vpop.eup %3425  ;;  %v1083_v8 = vpack.c.bf16 %v1079_v4, %v1079_v4 }
 0x4ac   : > { %v1054_v3 = vmul.f32 0.17677669, %v3426_v63 }
 0x4ae   : > { %v1056_v9 = vmul.f32 %v1054_v3, %v3958_v61 }
 0x4b0   : > { %v1080_v10 = vpack.c.bf16 %v1056_v9, %v1056_v9 }
 0x4b1   : > { %1088 = vrot.lane.b32.xlu0 %v1082_v1, %s3641_s15 }
 0x4b5   : > { %1137 = vrot.lane.b32.xlu0 %v1081_v5, %s3641_s15 }
 0x4b6   : > { %1140 = vrot.lane.b32.xlu1 %v1083_v8, %s3641_s15 }
 0x4b9   : > { %1347 = vrot.lane.b32.xlu0 %v3987_v21, %s3642_s26 }
 0x4ba   : > { %1085 = vrot.lane.b32.xlu1 %v1080_v10, %s3641_s15 }
 0x4bd   : > { %1325 = vrot.lane.b32.xlu0 %v3995_v28, %s3642_s26 }
 0x4be   : > { %1345 = vrot.lane.b32.xlu1 %v3976_v11, %s3642_s26 }
 0x4c2   : > { %1323 = vrot.lane.b32.xlu1 %v3962_v0, %s3642_s26 }
 0x528   : > { %v927_v12 = vpop.xlane.xlu0 %926 }
 0x529   : > { %3427 = vrcp.f32 %v927_v12 }
 0x52c   : > { %v1089_v13 = vpop.permute.xlu0 %1088 }
 0x52d   : > { %v1094_v14 = vsel %vm778_vm1, %v1089_v13, 0 }
 0x52e   : > { %3110 = vmatpush3.bf16.xpose.msra.mxu0 %v1094_v14 }
 0x52f   : > { %3121 = vmatprep.subr.bf16.mxu0 %v3636_v6 }
 0x530   : > { %v1138_v30 = vpop.permute.xlu0 %1137 }
 0x532   : > { %v930_v15 = vpop.xlane.xlu1 %929 }
 0x533   : > { %v3428_v16 = vpop.eup %3427  ;;  %3429 = vrcp.f32 %v930_v15 }
 0x534   : > { %v933_v19 = vmul.f32 %v3428_v16, %v3416_v42  ;;  %v1348_v37 = vpop.permute.xlu0 %1347 }
 0x535   : > { %v1354_v43 = vsel %vm778_vm1, %v1348_v37, 0.0 }
 0x536   : > { %v1141_v20 = vpop.permute.xlu1 %1140  ;;  %v935_v22 = vpack.c.bf16 %v933_v19, %v933_v19 }
 0x537   : > { %v1146_v29 = vsel %vm778_vm1, %v1141_v20, 0 }
 0x538   : > { %3100 = vmatmul.mubr.msk.bf16.vlgmr.msra.gmra.mrb[12].mxu1 %vm912_vm4, %v935_v22  ;;  %v1326_v45 = vpop.permute.xlu0 %1325 }
 0x539   : > { %3104 = vmatpush3.bf16.msra.mxu1 %v990_v23  ;;  %3105 = vmatprep.mubr.msk.bf16.mxu1 %vm3638_vm0, %v3636_v6  ;;  %v1332_v51 = vsel %vm778_vm1, %v1326_v45, 0.0 }
 0x53a   : > { %v1086_v24 = vpop.permute.xlu1 %1085  ;;  %3115 = vmatprep.subr.bf16.mxu1 %v3636_v6 }
 0x53b   : > { %3112 = vmatmul.mubr.msk.bf16.vlgmr.msra.gmra.mrb[4].mxu0 %vm778_vm1, %v1086_v24 }
 0x53c   : > { %3123 = vmatprep.mubr.msk.bf16.mxu0 %vm3638_vm0, %v3636_v6 }
 0x53d   : > { %v3430_v48 = vpop.eup %3429 }
 0x53e   : > { %v934_v25 = vmul.f32 %v3430_v48, %v3418_v54  ;;  %v1346_v53 = vpop.permute.xlu1 %1345 }
 0x53f   : > { %v1351_v60 = vsel %vm778_vm1, %v1346_v53, 0.0 }
 0x540   : > { %v936_v26 = vpack.c.bf16 %v934_v25, %v934_v25 }
 0x542   : > { %3106 = vmatmul.mubr.msk.bf16.vlgmr.msra.gmra.mrb[16].mxu1 %vm912_vm4, %v936_v26  ;;  %v1324_v62 = vpop.permute.xlu1 %1323 }
 0x543   : > { %3116 = vmatpush3.bf16.xpose.msra.mxu1 %v1146_v29  ;;  %3117 = vmatprep.mubr.msk.bf16.mxu1 %vm3638_vm0, %v3636_v6  ;;  %v1329_v63 = vsel %vm778_vm1, %v1324_v62, 0.0 }
 0x544   : > { %3127 = vmatprep.subr.bf16.mxu1 %v3636_v6 }
 0x54a   : > { %3118 = vmatmul.mubr.msk.bf16.vlgmr.msra.gmra.mrb[20].mxu1 %vm778_vm1, %v1138_v30 }
 0x54b   : > { %3129 = vmatprep.mubr.msk.bf16.mxu1 %vm3638_vm0, %v3636_v6 }
 0x60b   : > { %v980_v32 = vpop.f32.mrb[12].mxu1 }
 0x60c   : > { %1032 = vst.msk [vmem:[#allocation3] sm:$0xff] %vm778_vm1, %v980_v32  ;;  %v3101_v33 = vpop.f32.mrb[13].mxu1 }
 0x60d   : > { %v983_v34 = vpop.f32.mrb[14].mxu1 }
 0x60e   : > { %v3102_v35 = vpop.f32.mrb[15].mxu1  ;;  %v1130_v36 = vpop.f32.mrb[4].mxu0 }
 0x60f   : > { %v1188_v38 = vsel %vm4028_vm3, %v1130_v36, -1e+30  ;;  %v3113_v39 = vpop.f32.mrb[5].mxu0 }
 0x610   : > { %v1133_v40 = vpop.f32.mrb[6].mxu0  ;;  %v1190_v41 = vsel %vm912_vm4, %v1188_v38, -inf }
 0x611   : > { %1191 = vmax.xlane.f32.xlu1 %v1190_v41  ;;  %v3114_v42 = vpop.f32.mrb[7].mxu0 }
 0x615   : > { %v1026_v46 = vpop.f32.mrb[16].mxu1  ;;  %1355 = vadd.xlane.f32.xlu1 %v1354_v43 }
 0x616   : > { %1033 = vst.msk [vmem:[#allocation3 + $0x8] sm:$0xff] %vm778_vm1, %v1026_v46  ;;  %v3107_v47 = vpop.f32.mrb[17].mxu1 }
 0x617   : > { %v1029_v49 = vpop.f32.mrb[18].mxu1 }
 0x618   : > { %v3108_v50 = vpop.f32.mrb[19].mxu1 }
 0x619   : > { %1333 = vadd.xlane.f32.xlu1 %v1332_v51 }
 0x61d   : > { %v1182_v52 = vpop.f32.mrb[20].mxu1 }
 0x61e   : > { %v1189_v54 = vsel %vm4028_vm3, %v1182_v52, -1e+30  ;;  %v3119_v55 = vpop.f32.mrb[21].mxu1 }
 0x61f   : > { %v1185_v56 = vpop.f32.mrb[22].mxu1  ;;  %v1193_v57 = vsel %vm912_vm4, %v1189_v54, -inf }
 0x620   : > { %1194 = vmax.xlane.f32.xlu0 %v1193_v57  ;;  %v3120_v58 = vpop.f32.mrb[23].mxu1 }
 0x624   : > { %1352 = vadd.xlane.f32.xlu0 %v1351_v60 }
 0x628   : > { %1330 = vadd.xlane.f32.xlu0 %v1329_v63 }
 0x62a   : > { %1264 = vrot.lane.b32.xlu1 %v4064_v17, %s3641_s15 }
 0x69e   : > { %v1192_v1 = vpop.xlane.xlu1 %1191 }
 0x69f   : > { %v1196_v2 = vsub.f32 %v1188_v38, %v1192_v1 }
 0x6a1   : > { %v1198_v3 = vmul.f32 1.442695, %v1196_v2 }
 0x6a2   : > { %v1356_v4 = vpop.xlane.xlu1 %1355 }
 0x6a3   : > { %3431 = vpow2.f32 %v1198_v3  ;;  %v1358_v12 = vmul.f32 0.03125, %v1356_v4 }
 0x6a5   : > { %v1360_v20 = vadd.f32 1.1920929e-07, %v1358_v12 }
 0x6a6   : > { %v1334_v5 = vpop.xlane.xlu1 %1333 }
 0x6a7   : > { %v1336_v14 = vmul.f32 0.03125, %v1334_v5 }
 0x6a9   : > { %v1338_v23 = vadd.f32 1.1920929e-07, %v1336_v14 }
 0x6aa   : > { %v1265_v8 = vpop.permute.xlu1 %1264 }
 0x6ab   : > { %v1270_v9 = vsel %vm942_vm2, %v1265_v8, 0 }
 0x6ac   : > { %3128 = vmatpush3.bf16.msra.mxu1 %v1270_v9 }
 0x6ad   : > { %v3432_v10 = vpop.eup %3431  ;;  %v1195_v13 = vpop.xlane.xlu0 %1194  ;;  %3139 = vmatprep.subr.bf16.mxu1 %v3636_v6 }
 0x6ae   : > { %v1197_v15 = vsub.f32 %v1189_v54, %v1195_v13  ;;  %v1202_v16 = vsel %vm912_vm4, %v3432_v10, 0.0 }
 0x6af   : > { %1203 = vadd.xlane.f32.xlu0 %v1202_v16 }
 0x6b0   : > { %v1200_v19 = vmul.f32 1.442695, %v1197_v15 }
 0x6b1   : > { %v1353_v22 = vpop.xlane.xlu0 %1352 }
 0x6b2   : > { %3433 = vpow2.f32 %v1200_v19  ;;  %v1357_v24 = vmul.f32 0.03125, %v1353_v22 }
 0x6b3   : > { %3435 = vrsqrt.f32 %v1360_v20 }
 0x6b4   : > { %3437 = vrsqrt.f32 %v1338_v23  ;;  %v1359_v26 = vadd.f32 1.1920929e-07, %v1357_v24 }
 0x6b5   : > { %v1331_v48 = vpop.xlane.xlu0 %1330 }
 0x6b6   : > { %v1335_v25 = vmul.f32 0.03125, %v1331_v48  ;;  %3439 = vrsqrt.f32 %v1359_v26 }
 0x6b8   : > { %v1337_v29 = vadd.f32 1.1920929e-07, %v1335_v25 }
 0x6ba   : > { %3441 = vrsqrt.f32 %v1337_v29 }
 0x6bc   : > { %v3434_v30 = vpop.eup %3433 }
 0x6bd   : > { %v1205_v32 = vsel %vm912_vm4, %v3434_v30, 0.0  ;;  %v3436_v33 = vpop.eup %3435 }
 0x6be   : > { %1206 = vadd.xlane.f32.xlu1 %v1205_v32  ;;  %v3438_v34 = vpop.eup %3437  ;;  %v1364_v36 = vmul.f32 %v3436_v33, %v3983_v18 }
 0x6bf   : > { %v1342_v35 = vmul.f32 0.17677669, %v3438_v34 }
 0x6c0   : > { %v3440_v37 = vpop.eup %3439  ;;  %v1368_v39 = vpack.c.bf16 %v1364_v36, %v1364_v36 }
 0x6c1   : > { %v1344_v40 = vmul.f32 %v1342_v35, %v3991_v27  ;;  %v1363_v42 = vmul.f32 %v3440_v37, %v3969_v7 }
 0x6c3   : > { %v1366_v43 = vpack.c.bf16 %v1344_v40, %v1344_v40  ;;  %v1367_v45 = vpack.c.bf16 %v1363_v42, %v1363_v42 }
 0x6c4   : > { %v3442_v38 = vpop.eup %3441 }
 0x6c5   : > { %1215 = vrot.lane.b32.xlu0 %v4019_v59, %s3641_s15  ;;  %v1341_v41 = vmul.f32 0.17677669, %v3442_v38 }
 0x6c7   : > { %v1343_v46 = vmul.f32 %v1341_v41, %v3958_v61 }
 0x6c9   : > { %1425 = vrot.lane.b32.xlu0 %v1368_v39, %s3642_s26  ;;  %v1365_v47 = vpack.c.bf16 %v1343_v46, %v1343_v46 }
 0x6cd   : > { %1422 = vrot.lane.b32.xlu0 %v1366_v43, %s3642_s26 }
 0x6cf   : > { %1373 = vrot.lane.b32.xlu1 %v1367_v45, %s3642_s26 }
 0x6d1   : > { %1630 = vrot.lane.b32.xlu0 %v3987_v21, %s3643_s14 }
 0x6d3   : > { %1370 = vrot.lane.b32.xlu1 %v1365_v47, %s3642_s26 }
 0x6d5   : > { %1608 = vrot.lane.b32.xlu0 %v3995_v28, %s3643_s14 }
 0x6d7   : > { %1628 = vrot.lane.b32.xlu1 %v3976_v11, %s3643_s14 }
 0x6db   : > { %1606 = vrot.lane.b32.xlu1 %v3962_v0, %s3643_s14 }
 0x73c   : > { %v1204_v49 = vpop.xlane.xlu0 %1203 }
 0x73d   : > { %3443 = vrcp.f32 %v1204_v49 }
 0x740   : > { %v1216_v50 = vpop.permute.xlu0 %1215 }
 0x741   : > { %v1221_v51 = vsel %vm942_vm2, %v1216_v50, 0 }
 0x742   : > { %3122 = vmatpush3.bf16.msra.mxu0 %v1221_v51 }
 0x743   : > { %3133 = vmatprep.subr.bf16.mxu0 %v3636_v6 }
 0x744   : > { %v1426_v57 = vpop.permute.xlu0 %1425 }
 0x745   : > { %v1431_v60 = vsel %vm778_vm1, %v1426_v57, 0 }
 0x747   : > { %v3444_v21 = vpop.eup %3443 }
 0x748   : > { %v1210_v52 = vmul.f32 %v3444_v21, %v3432_v10  ;;  %v1423_v62 = vpop.permute.xlu0 %1422 }
 0x74a   : > { %v1212_v53 = vpack.c.bf16 %v1210_v52, %v1210_v52 }
 0x74b   : > { %v1207_v54 = vpop.xlane.xlu1 %1206 }
 0x74c   : > { %3445 = vrcp.f32 %v1207_v54  ;;  %3124 = vmatmul.mubr.msk.bf16.vlgmr.msra.gmra.mrb[8].mxu0 %vm912_vm4, %v1212_v53  ;;  %v1631_v5 = vpop.permute.xlu0 %1630 }
 0x74d   : > { %3135 = vmatprep.mubr.msk.bf16.mxu0 %vm3638_vm0, %v3636_v6  ;;  %v1637_v20 = vsel %vm778_vm1, %v1631_v5, 0.0 }
 0x74f   : > { %v1374_v11 = vpop.permute.xlu1 %1373 }
 0x750   : > { %v1379_v0 = vsel %vm778_vm1, %v1374_v11, 0  ;;  %v1609_v22 = vpop.permute.xlu0 %1608 }
 0x751   : > { %3134 = vmatpush3.bf16.xpose.msra.mxu0 %v1379_v0  ;;  %v1615_v23 = vsel %vm778_vm1, %v1609_v22, 0.0 }
 0x752   : > { %3145 = vmatprep.subr.bf16.mxu0 %v3636_v6 }
 0x753   : > { %v1371_v56 = vpop.permute.xlu1 %1370 }
 0x756   : > { %v3446_v28 = vpop.eup %3445 }
 0x757   : > { %v1211_v55 = vmul.f32 %v3446_v28, %v3434_v30  ;;  %v1629_v48 = vpop.permute.xlu1 %1628 }
 0x758   : > { %3136 = vmatmul.mubr.msk.bf16.vlgmr.msra.gmra.mrb[12].mxu0 %vm778_vm1, %v1371_v56  ;;  %v1634_v33 = vsel %vm778_vm1, %v1629_v48, 0.0 }
 0x759   : > { %v1213_v58 = vpack.c.bf16 %v1211_v55, %v1211_v55  ;;  %3147 = vmatprep.mubr.msk.bf16.mxu0 %vm3638_vm0, %v3636_v6 }
 0x75b   : > { %3130 = vmatmul.mubr.msk.bf16.vlgmr.msra.gmra.mrb[24].mxu1 %vm912_vm4, %v1213_v58  ;;  %v1607_v34 = vpop.permute.xlu1 %1606 }
 0x75c   : > { %3140 = vmatpush3.bf16.xpose.msra.mxu1 %v1431_v60  ;;  %3141 = vmatprep.mubr.msk.bf16.mxu1 %vm3638_vm0, %v3636_v6  ;;  %v1612_v35 = vsel %vm778_vm1, %v1607_v34, 0.0 }
 0x75d   : > { %3151 = vmatprep.subr.bf16.mxu1 %v3636_v6 }
 0x763   : > { %3142 = vmatmul.mubr.msk.bf16.vlgmr.msra.gmra.mrb[28].mxu1 %vm778_vm1, %v1423_v62 }
 0x764   : > { %3153 = vmatprep.mubr.msk.bf16.mxu1 %vm3638_vm0, %v3636_v6 }
 0x81f   : > { %v4137_v63 = vpop.f32.mrb[8].mxu0 }
 0x820   : > { %v3125_v1 = vpop.f32.mrb[9].mxu0 }
 0x821   : > { %v1260_v2 = vpop.f32.mrb[10].mxu0 }
 0x822   : > { %v3126_v3 = vpop.f32.mrb[11].mxu0 }
 0x82b   : > { %v1415_v4 = vpop.f32.mrb[12].mxu0 }
 0x82c   : > { %v1473_v8 = vsel %vm4028_vm3, %v1415_v4, -1e+30  ;;  %v3137_v9 = vpop.f32.mrb[13].mxu0 }
 0x82d   : > { %v1418_v10 = vpop.f32.mrb[14].mxu0  ;;  %v1475_v12 = vsel %vm912_vm4, %v1473_v8, -inf }
 0x82e   : > { %v4142_v13 = vpop.f32.mrb[24].mxu1  ;;  %1476 = vmax.xlane.f32.xlu1 %v1475_v12  ;;  %v3138_v14 = vpop.f32.mrb[15].mxu0 }
 0x82f   : > { %v3131_v15 = vpop.f32.mrb[25].mxu1 }
 0x830   : > { %v1309_v16 = vpop.f32.mrb[26].mxu1 }
 0x831   : > { %v3132_v19 = vpop.f32.mrb[27].mxu1 }
 0x832   : > { %1638 = vadd.xlane.f32.xlu1 %v1637_v20 }
 0x836   : > { %v1467_v24 = vpop.f32.mrb[28].mxu1  ;;  %1616 = vadd.xlane.f32.xlu1 %v1615_v23 }
 0x837   : > { %v1474_v25 = vsel %vm4028_vm3, %v1467_v24, -1e+30  ;;  %v3143_v26 = vpop.f32.mrb[29].mxu1 }
 0x838   : > { %v1470_v29 = vpop.f32.mrb[30].mxu1  ;;  %v1478_v30 = vsel %vm912_vm4, %v1474_v25, -inf }
 0x839   : > { %1479 = vmax.xlane.f32.xlu0 %v1478_v30  ;;  %v3144_v32 = vpop.f32.mrb[31].mxu1 }
 0x83d   : > { %1635 = vadd.xlane.f32.xlu0 %v1634_v33 }
 0x841   : > { %1613 = vadd.xlane.f32.xlu0 %v1612_v35 }
 0x847   : > { %1547 = vrot.lane.b32.xlu1 %v4064_v17, %s3642_s26 }
 0x8bb   : > { %v1477_v36 = vpop.xlane.xlu1 %1476 }
 0x8bc   : > { %v1481_v37 = vsub.f32 %v1473_v8, %v1477_v36 }
 0x8be   : > { %v1483_v38 = vmul.f32 1.442695, %v1481_v37 }
 0x8bf   : > { %v1639_v39 = vpop.xlane.xlu1 %1638 }
 0x8c0   : > { %3447 = vpow2.f32 %v1483_v38  ;;  %v1641_v49 = vmul.f32 0.03125, %v1639_v39 }
 0x8c2   : > { %v1643_v53 = vadd.f32 1.1920929e-07, %v1641_v49 }
 0x8c3   : > { %v1617_v40 = vpop.xlane.xlu1 %1616 }
 0x8c4   : > { %v1619_v51 = vmul.f32 0.03125, %v1617_v40 }
 0x8c6   : > { %v1480_v41 = vpop.xlane.xlu0 %1479  ;;  %v1621_v11 = vadd.f32 1.1920929e-07, %v1619_v51 }
 0x8c7   : > { %v1482_v42 = vsub.f32 %v1474_v25, %v1480_v41  ;;  %v1548_v43 = vpop.permute.xlu1 %1547 }
 0x8c8   : > { %v1553_v45 = vsel %vm942_vm2, %v1548_v43, 0 }
 0x8c9   : > { %v1485_v46 = vmul.f32 1.442695, %v1482_v42  ;;  %3152 = vmatpush3.bf16.msra.mxu1 %v1553_v45 }
 0x8ca   : > { %v3448_v47 = vpop.eup %3447  ;;  %v1636_v50 = vpop.xlane.xlu0 %1635  ;;  %3163 = vmatprep.subr.bf16.mxu1 %v3636_v6 }
 0x8cb   : > { %3449 = vpow2.f32 %v1485_v46  ;;  %v1487_v21 = vsel %vm912_vm4, %v3448_v47, 0.0  ;;  %v1640_v52 = vmul.f32 0.03125, %v1636_v50 }
 0x8cc   : > { %1488 = vadd.xlane.f32.xlu0 %v1487_v21  ;;  %3451 = vrsqrt.f32 %v1643_v53 }
 0x8cd   : > { %v1642_v28 = vadd.f32 1.1920929e-07, %v1640_v52  ;;  %3453 = vrsqrt.f32 %v1621_v11 }
 0x8ce   : > { %v1614_v54 = vpop.xlane.xlu0 %1613 }
 0x8cf   : > { %v1618_v0 = vmul.f32 0.03125, %v1614_v54  ;;  %3455 = vrsqrt.f32 %v1642_v28 }
 0x8d1   : > { %v1620_v55 = vadd.f32 1.1920929e-07, %v1618_v0 }
 0x8d3   : > { %3457 = vrsqrt.f32 %v1620_v55 }
 0x8d5   : > { %v3450_v56 = vpop.eup %3449 }
 0x8d6   : > { %v1490_v57 = vsel %vm912_vm4, %v3450_v56, 0.0  ;;  %v3452_v58 = vpop.eup %3451 }
 0x8d7   : > { %1491 = vadd.xlane.f32.xlu1 %v1490_v57  ;;  %v3454_v60 = vpop.eup %3453  ;;  %v1647_v3 = vmul.f32 %v3452_v58, %v3983_v18 }
 0x8d8   : > { %v1625_v2 = vmul.f32 0.17677669, %v3454_v60 }
 0x8d9   : > { %v3456_v62 = vpop.eup %3455  ;;  %v1651_v8 = vpack.c.bf16 %v1647_v3, %v1647_v3 }
 0x8da   : > { %v1646_v5 = vmul.f32 %v3456_v62, %v3969_v7  ;;  %v1627_v9 = vmul.f32 %v1625_v2, %v3991_v27 }
 0x8dc   : > { %v1650_v10 = vpack.c.bf16 %v1646_v5, %v1646_v5  ;;  %v1649_v14 = vpack.c.bf16 %v1627_v9, %v1627_v9 }
 0x8dd   : > { %v3458_v1 = vpop.eup %3457 }
 0x8de   : > { %v1624_v4 = vmul.f32 0.17677669, %v3458_v1 }
 0x8e0   : > { %v1626_v12 = vmul.f32 %v1624_v4, %v3958_v61 }
 0x8e2   : > { %1499 = vrot.lane.b32.xlu0 %v4019_v59, %s3642_s26  ;;  %v1648_v18 = vpack.c.bf16 %v1626_v12, %v1626_v12 }
 0x8e6   : > { %1708 = vrot.lane.b32.xlu0 %v1651_v8, %s3643_s14 }
 0x8e8   : > { %1656 = vrot.lane.b32.xlu1 %v1650_v10, %s3643_s14 }
 0x8ea   : > { %1705 = vrot.lane.b32.xlu0 %v1649_v14, %s3643_s14 }
 0x8ec   : > { %1653 = vrot.lane.b32.xlu1 %v1648_v18, %s3643_s14 }
 0x959   : > { %v1489_v15 = vpop.xlane.xlu0 %1488 }
 0x95a   : > { %3459 = vrcp.f32 %v1489_v15  ;;  %v3315_v15 = vld [vmem:[%s3883_s13] sm:$0xff]  }
 0x95d   : > { %v1500_v16 = vpop.permute.xlu0 %1499 }
 0x95e   : > { %v1505_v7 = vsel %vm942_vm2, %v1500_v16, 0  ;;  %v3316_v16 = vld [vmem:[%s3883_s13 + $0x8] sm:$0xff]  }
 0x95f   : > { %3146 = vmatpush3.bf16.msra.mxu0 %v1505_v7  ;;  %v3317_v7 = vld [vmem:[%s3883_s13 + $0x10] sm:$0xff]  }
 0x960   : > { %3157 = vmatprep.subr.bf16.mxu0 %v3636_v6 }
 0x961   : > { %v1709_v26 = vpop.permute.xlu0 %1708 }
 0x962   : > { %v1714_v30 = vsel %vm778_vm1, %v1709_v26, 0 }
 0x964   : > { %v3460_v27 = vpop.eup %3459  ;;  %v1492_v19 = vpop.xlane.xlu1 %1491 }
 0x965   : > { %v1495_v20 = vmul.f32 %v3460_v27, %v3448_v47  ;;  %3461 = vrcp.f32 %v1492_v19  ;;  %v1706_v32 = vpop.permute.xlu0 %1705  ;;  %v3318_v27 = vld [vmem:[%s3883_s13 + $0x18] sm:$0xff]   ;;  %v3319_v19 = vld [vmem:[%s3883_s13 + $0x20] sm:$0xff]  }
 0x967   : > { %v1497_v61 = vpack.c.bf16 %v1495_v20, %v1495_v20  ;;  %v3320_v20 = vld [vmem:[%s3883_s13 + $0x28] sm:$0xff]  }
 0x968   : > { %v1657_v22 = vpop.permute.xlu1 %1656 }
 0x969   : > { %v1662_v23 = vsel %vm778_vm1, %v1657_v22, 0  ;;  %3148 = vmatmul.mubr.msk.bf16.vlgmr.msra.gmra.mrb[16].mxu0 %vm912_vm4, %v1497_v61  ;;  %v3321_v61 = vld [vmem:[%s3883_s13 + $0x30] sm:$0xff]  }
 0x96a   : > { %3158 = vmatpush3.bf16.xpose.msra.mxu0 %v1662_v23  ;;  %3159 = vmatprep.mubr.msk.bf16.mxu0 %vm3638_vm0, %v3636_v6 }
 0x96b   : > { %3169 = vmatprep.subr.bf16.mxu0 %v3636_v6 }
 0x96c   : > { %v1654_v25 = vpop.permute.xlu1 %1653 }
 0x96f   : > { %v3462_v24 = vpop.eup %3461 }
 0x970   : > { %v1496_v48 = vmul.f32 %v3462_v24, %v3450_v56 }
 0x971   : > { %3160 = vmatmul.mubr.msk.bf16.vlgmr.msra.gmra.mrb[20].mxu0 %vm778_vm1, %v1654_v25 }
 0x972   : > { %v1498_v29 = vpack.c.bf16 %v1496_v48, %v1496_v48  ;;  %3171 = vmatprep.mubr.msk.bf16.mxu0 %vm3638_vm0, %v3636_v6  ;;  %v3322_v48 = vld [vmem:[%s3883_s13 + $0x38] sm:$0xff]  }
 0x974   : > { %3154 = vmatmul.mubr.msk.bf16.vlgmr.msra.gmra.mrb[32].mxu1 %vm912_vm4, %v1498_v29 }
 0x975   : > { %3164 = vmatpush3.bf16.xpose.msra.mxu1 %v1714_v30  ;;  %3165 = vmatprep.mubr.msk.bf16.mxu1 %vm3638_vm0, %v3636_v6 }
 0x976   : > { %3175 = vmatprep.subr.bf16.mxu1 %v3636_v6 }
 0x97c   : > { %3166 = vmatmul.mubr.msk.bf16.vlgmr.msra.gmra.mrb[36].mxu1 %vm778_vm1, %v1706_v32 }
 0x97d   : > { %3177 = vmatprep.mubr.msk.bf16.mxu1 %vm3638_vm0, %v3636_v6 }
 0xa3c   : > { %v1541_v33 = vpop.f32.mrb[16].mxu0 }
 0xa3d   : > { %v3149_v34 = vpop.f32.mrb[17].mxu0 }
 0xa3e   : > { %v1544_v35 = vpop.f32.mrb[18].mxu0 }
 0xa3f   : > { %v3150_v36 = vpop.f32.mrb[19].mxu0 }
 0xa44   : > { %v1698_v37 = vpop.f32.mrb[20].mxu0 }
 0xa45   : > { %v1756_v38 = vsel %vm4028_vm3, %v1698_v37, -1e+30  ;;  %v3161_v39 = vpop.f32.mrb[21].mxu0  ;;  %v3323_v37 = vld [vmem:[%s3872_s12] ss:$16 sps:$4 sm:$0xff]  }
 0xa46   : > { %v1701_v40 = vpop.f32.mrb[22].mxu0  ;;  %v1758_v41 = vsel %vm912_vm4, %v1756_v38, -inf  ;;  %v3326_v39 = vld [vmem:[%s3872_s12 + $0x8] ss:$16 sps:$4 sm:$0xff]  }
 0xa47   : > { %v1589_v42 = vpop.f32.mrb[32].mxu1  ;;  %1759 = vmax.xlane.f32.xlu1 %v1758_v41  ;;  %v3162_v43 = vpop.f32.mrb[23].mxu0  ;;  %v3328_v40 = vld [vmem:[%s3872_s12 + $0xc] ss:$16 sps:$4 sm:$0xff]   ;;  %v3331_v41 = vld [vmem:[%s3872_s12 + $0x24] ss:$16 sps:$4 sm:$0xff]  }
 0xa48   : > { %v3155_v45 = vpop.f32.mrb[33].mxu1  ;;  %v3329_v43 = vld [vmem:[%s3872_s12 + $0x20] ss:$16 sps:$4 sm:$0xff]  }
 0xa49   : > { %v1592_v46 = vpop.f32.mrb[34].mxu1  ;;  %v3332_v45 = vld [vmem:[%s3872_s12 + $0x28] ss:$16 sps:$4 sm:$0xff]  }
 0xa4a   : > { %v3156_v47 = vpop.f32.mrb[35].mxu1  ;;  %v3337_v46 = vld [vmem:[%s3872_s12 + $0x44] ss:$16 sps:$4 sm:$0xff]  }
 0xa4b   : > { %v3340_v47 = vld [vmem:[%s3872_s12 + $0x4c] ss:$16 sps:$4 sm:$0xff]  }
 0xa4f   : > { %v1750_v49 = vpop.f32.mrb[36].mxu1 }
 0xa50   : > { %v1757_v50 = vsel %vm4028_vm3, %v1750_v49, -1e+30  ;;  %v3167_v51 = vpop.f32.mrb[37].mxu1  ;;  %v3338_v49 = vld [vmem:[%s3872_s12 + $0x48] ss:$16 sps:$4 sm:$0xff]  }
 0xa51   : > { %v1753_v21 = vpop.f32.mrb[38].mxu1  ;;  %v1761_v52 = vsel %vm912_vm4, %v1757_v50, -inf  ;;  %v3475_v51 = vld [vmem:[#allocation2] sm:$0xff] }
 0xa52   : > { %1762 = vmax.xlane.f32.xlu0 %v1761_v52  ;;  %v3168_v53 = vpop.f32.mrb[39].mxu1 }
 0xad4   : > { %v1760_v54 = vpop.xlane.xlu1 %1759 }
 0xad5   : > { %v1764_v11 = vsub.f32 %v1756_v38, %v1760_v54  ;;  %v3325_v38 = vld [vmem:[%s3872_s12 + $0x4] ss:$16 sps:$4 sm:$0xff]   ;;  %v3476_v54 = vld [vmem:[#allocation2 + $0x8] sm:$0xff] }
 0xad7   : > { %v1766_v0 = vmul.f32 1.442695, %v1764_v11 }
 0xad9   : > { %3463 = vpow2.f32 %v1766_v0 }
 0xadf   : > { %v1763_v28 = vpop.xlane.xlu0 %1762 }
 0xae0   : > { %v1765_v55 = vsub.f32 %v1757_v50, %v1763_v28 }
 0xae2   : > { %v1768_v56 = vmul.f32 1.442695, %v1765_v55 }
 0xae3   : > { %v3464_v57 = vpop.eup %3463 }
 0xae4   : > { %3465 = vpow2.f32 %v1768_v56  ;;  %v1770_v58 = vsel %vm912_vm4, %v3464_v57, 0.0  ;;  %v3343_v56 = vld [vmem:[%s3872_s12 + $0x64] ss:$16 sps:$4 sm:$0xff]  }
 0xae5   : > { %1771 = vadd.xlane.f32.xlu0 %v1770_v58  ;;  %v3341_v58 = vld [vmem:[%s3872_s12 + $0x60] ss:$16 sps:$4 sm:$0xff]  }
 0xaee   : > { %v3466_v44 = vpop.eup %3465 }
 0xaef   : > { %v1773_v60 = vsel %vm912_vm4, %v3466_v44, 0.0 }
 0xaf0   : > { %1774 = vadd.xlane.f32.xlu1 %v1773_v60  ;;  %v3349_v60 = vld [vmem:[%s3872_s12 + $0x84] ss:$16 sps:$4 sm:$0xff]  }
 0xafb   : > { %1782 = vrot.lane.b32.xlu0 %v4019_v59, %s3643_s14 }
 0xaff   : > { %1316 = vrot.lane.b32.xlu0 %v4142_v13, %s3643_s14 }
 0xb01   : > { %1830 = vrot.lane.b32.xlu1 %v4064_v17, %s3643_s14 }
 0xb03   : > { %1599 = vrot.lane.b32.xlu0 %v1589_v42, %s3642_s26  ;;  %v3334_v42 = vld [vmem:[%s3872_s12 + $0x2c] ss:$16 sps:$4 sm:$0xff]  }
 0xb05   : > { %1314 = vrot.lane.b32.xlu1 %v4137_v63, %s3643_s14 }
 0xb09   : > { %1597 = vrot.lane.b32.xlu1 %v1541_v33, %s3642_s26 }
 0xb72   : > { %v1772_v62 = vpop.xlane.xlu0 %1771 }
 0xb73   : > { %3467 = vrcp.f32 %v1772_v62  ;;  %v3352_v62 = vld [vmem:[%s3872_s12 + $0x8c] ss:$16 sps:$4 sm:$0xff]  }
 0xb76   : > { %v1783_v1 = vpop.permute.xlu0 %1782 }
 0xb77   : > { %v1788_v2 = vsel %vm942_vm2, %v1783_v1, 0  ;;  %v3347_v1 = vld [vmem:[%s3872_s12 + $0x80] ss:$16 sps:$4 sm:$0xff]  }
 0xb78   : > { %3170 = vmatpush3.bf16.msra.mxu0 %v1788_v2  ;;  %v3350_v2 = vld [vmem:[%s3872_s12 + $0x88] ss:$16 sps:$4 sm:$0xff]  }
 0xb79   : > { %3181 = vmatprep.subr.bf16.mxu0 %v3636_v6 }
 0xb7a   : > { %v1317_v59 = vpop.permute.xlu0 %1316 }
 0xb7b   : > { %1322 = vst.msk [vmem:[#allocation3 + $0x8] sm:$0xff] %vm1320_vm5, %v1317_v59  ;;  %v3355_v59 = vld [vmem:[%s3872_s12 + $0xa4] ss:$16 sps:$4 sm:$0xff]  }
 0xb7d   : > { %v3468_v17 = vpop.eup %3467  ;;  %v1775_v13 = vpop.xlane.xlu1 %1774 }
 0xb7e   : > { %v1778_v3 = vmul.f32 %v3468_v17, %v3464_v57  ;;  %3469 = vrcp.f32 %v1775_v13  ;;  %v1600_v63 = vpop.permute.xlu0 %1599  ;;  %v3346_v57 = vld [vmem:[%s3872_s12 + $0x6c] ss:$16 sps:$4 sm:$0xff]   ;;  %v3353_v17 = vld [vmem:[%s3872_s12 + $0xa0] ss:$16 sps:$4 sm:$0xff]   ;;  %v3356_v13 = vld [vmem:[%s3872_s12 + $0xa8] ss:$16 sps:$4 sm:$0xff]  }
 0xb7f   : > { %1605 = vst.msk [vmem:[#allocation3 + $0x8] sm:$0xff] %vm1603_vm6, %v1600_v63  ;;  %v3361_v63 = vld [vmem:[%s3872_s12 + $0xc4] ss:$16 sps:$4 sm:$0xff]  }
 0xb80   : > { %v1780_v4 = vpack.c.bf16 %v1778_v3, %v1778_v3  ;;  %v3358_v3 = vld [vmem:[%s3872_s12 + $0xac] ss:$16 sps:$4 sm:$0xff]  }
 0xb81   : > { %v1831_v5 = vpop.permute.xlu1 %1830 }
 0xb82   : > { %v1836_v8 = vsel %vm942_vm2, %v1831_v5, 0  ;;  %3172 = vmatmul.mubr.msk.bf16.vlgmr.msra.gmra.mrb[24].mxu0 %vm912_vm4, %v1780_v4  ;;  %v3364_v4 = vld [vmem:[%s3872_s12 + $0xcc] ss:$16 sps:$4 sm:$0xff]   ;;  %v3359_v5 = vld [vmem:[%s3872_s12 + $0xc0] ss:$16 sps:$4 sm:$0xff]  }
 0xb83   : > { %3176 = vmatpush3.bf16.msra.mxu1 %v1836_v8  ;;  %3197 = vmatprep.mubr.msk.bf16.mxu0 %vm3638_vm0, %v3636_v6  ;;  %v3362_v8 = vld [vmem:[%s3872_s12 + $0xc8] ss:$16 sps:$4 sm:$0xff]  }
 0xb84   : > { %3182 = vmatpush3.bf16.msra.mxu0 %v3315_v15  ;;  %2206 = vmatprep.subr.bf16.mxu1 %v3325_v38  ;;  %v3372_v15 = vld [vmem:[%s3885_s25 + $0xc0] sm:$0xff]   ;;  %v3383_v38 = vld [vmem:[%s3885_s25 + $0x58] sm:$0xff]  }
 0xb85   : > { %v1315_v9 = vpop.permute.xlu1 %1314  ;;  %3183 = vmatprep.subr.bf16.mxu0 %v3636_v6 }
 0xb86   : > { %1321 = vst.msk [vmem:[#allocation3] sm:$0xff] %vm1320_vm5, %v1315_v9  ;;  %v3367_v9 = vld [vmem:[%s3872_s12 + $0xe4] ss:$16 sps:$4 sm:$0xff]  }
 0xb88   : > { %v3470_v10 = vpop.eup %3469  ;;  %3184 = vmatpush3.bf16.msra.mxu0 %v3316_v16 }
 0xb89   : > { %v1779_v12 = vmul.f32 %v3470_v10, %v3466_v44  ;;  %v1598_v14 = vpop.permute.xlu1 %1597  ;;  %3185 = vmatprep.subr.bf16.mxu0 %v3636_v6  ;;  %v3344_v44 = vld [vmem:[%s3872_s12 + $0x68] ss:$16 sps:$4 sm:$0xff]   ;;  %v3370_v10 = vld [vmem:[%s3872_s12 + $0xec] ss:$16 sps:$4 sm:$0xff]  }
 0xb8a   : > { %1604 = vst.msk [vmem:[#allocation3] sm:$0xff] %vm1603_vm6, %v1598_v14  ;;  %v3368_v14 = vld [vmem:[%s3872_s12 + $0xe8] ss:$16 sps:$4 sm:$0xff]  }
 0xb8b   : > { %v1781_v18 = vpack.c.bf16 %v1779_v12, %v1779_v12  ;;  %v3365_v12 = vld [vmem:[%s3872_s12 + $0xe0] ss:$16 sps:$4 sm:$0xff]  }
 0xb8c   : > { %3186 = vmatpush3.bf16.msra.mxu0 %v3317_v7 }
 0xb8d   : > { %3178 = vmatmul.mubr.msk.bf16.vlgmr.msra.gmra.mrb[40].mxu1 %vm912_vm4, %v1781_v18  ;;  %3187 = vmatprep.subr.bf16.mxu0 %v3636_v6  ;;  %v3371_v18 = vld [vmem:[%s3885_s25 + $0x40] sm:$0xff]  }
 0xb8e   : > { %2238 = vmatprep.mubr.bf16.mxu1 %v3637_v31  ;;  %2207 = vmatpush1.bf16.msra.mxu1 %v3323_v37  ;;  %v3382_v37 = vld [vmem:[%s3885_s25 + $0x90] sm:$0xff]  }
 0xb8f   : > { %2208 = vmatprep.subr.bf16.mxu1 %v3331_v41  ;;  %v3386_v41 = vld [vmem:[%s3885_s25 + $0x98] sm:$0xff]  }
 0xb90   : > { %3188 = vmatpush3.bf16.msra.mxu0 %v3318_v27 }
 0xb91   : > { %3189 = vmatprep.subr.bf16.mxu0 %v3636_v6 }
 0xb92   : > { %2209 = vmatpush1.bf16.msra.mxu1 %v3329_v43  ;;  %v3388_v43 = vld [vmem:[%s3885_s25 + $0xe0] sm:$0xff]  }
 0xb93   : > { %2210 = vmatprep.subr.bf16.mxu1 %v3337_v46  ;;  %v3390_v46 = vld [vmem:[%s3885_s25 + $0xa0] sm:$0xff]  }
 0xb94   : > { %3190 = vmatpush3.bf16.msra.mxu0 %v3319_v19 }
 0xb95   : > { %3191 = vmatprep.subr.bf16.mxu0 %v3636_v6 }
 0xb98   : > { %3192 = vmatpush3.bf16.msra.mxu0 %v3320_v20 }
 0xb99   : > { %3193 = vmatprep.subr.bf16.mxu0 %v3636_v6 }
 0xb9c   : > { %3194 = vmatpush3.bf16.msra.mxu0 %v3321_v61 }
 0xb9d   : > { %3195 = vmatprep.subr.bf16.mxu0 %v3636_v6 }
 0xba0   : > { %3196 = vmatpush3.bf16.msra.mxu0 %v3322_v48 }
 0xba1   : > { %2249 = vmatprep.subr.bf16.mxu0 %v3328_v40  ;;  %v3385_v40 = vld [vmem:[%s3885_s25 + $0x18] sm:$0xff]  }
 0xc55   : > { %v1824_v22 = vpop.f32.mrb[24].mxu0 }
 0xc56   : > { %1880 = vrot.lane.b32.xlu1 %v1824_v22, %s3641_s15  ;;  %v3173_v23 = vpop.f32.mrb[25].mxu0 }
 0xc57   : > { %v1827_v24 = vpop.f32.mrb[26].mxu0 }
 0xc58   : > { %v3174_v25 = vpop.f32.mrb[27].mxu0 }
 0xc59   : > { %v3373_v25 = vld [vmem:[%s3885_s25] sm:$0xff]  }
 0xc60   : > { %v1872_v26 = vpop.f32.mrb[40].mxu1 }
 0xc61   : > { %1882 = vrot.lane.b32.xlu0 %v1872_v26, %s3641_s15  ;;  %v3179_v29 = vpop.f32.mrb[41].mxu1  ;;  %v3374_v26 = vld [vmem:[%s3885_s25 + $0x80] sm:$0xff]  }
 0xc62   : > { %v1875_v30 = vpop.f32.mrb[42].mxu1 }
 0xc63   : > { %v3180_v32 = vpop.f32.mrb[43].mxu1  ;;  %v3375_v30 = vld [vmem:[%s3885_s25 + $0x48] sm:$0xff]  }
 0xc64   : > { %v3376_v32 = vld [vmem:[%s3885_s25 + $0xc8] sm:$0xff]  }
 0xcc8   : > { %v1881_v33 = vpop.permute.xlu1 %1880 }
 0xcc9   : > { %1887 = vst.msk [vmem:[#allocation3] sm:$0xff] %vm1886_vm7, %v1881_v33  ;;  %v3377_v33 = vld [vmem:[%s3885_s25 + $0x8] sm:$0xff]  }
 0xcd0   : > { %v1889_v6 = vld [vmem:[#allocation3] sm:$0xff] }
 0xcd3   : > { %v1883_v34 = vpop.permute.xlu0 %1882 }
 0xcd4   : > { %1888 = vst.msk [vmem:[#allocation3 + $0x8] sm:$0xff] %vm1886_vm7, %v1883_v34  ;;  %v3378_v34 = vld [vmem:[%s3885_s25 + $0x88] sm:$0xff]  }
 0xcdb   : > { %v1890_v35 = vld [vmem:[#allocation3 + $0x8] sm:$0xff] }
 0xcdc   : > { %v1891_v36 = vpack.c.bf16 %v1890_v35, %v1889_v6  ;;  %v3379_v6 = vld [vmem:[%s3885_s25 + $0x50] sm:$0xff]  }
 0xcdd   : > { %v3380_v35 = vld [vmem:[%s3885_s25 + $0xd0] sm:$0xff]  }
 0xcde   : > { %3198 = vmatmul.mubr.bf16.vlgmr.msra.gmra.mrb[28].mxu0 %v1891_v36  ;;  %v3381_v36 = vld [vmem:[%s3885_s25 + $0x10] sm:$0xff]  }
 0xcdf   : > { %2281 = vmatprep.mubr.bf16.mxu0 %v3637_v31  ;;  %2250 = vmatpush1.bf16.msra.mxu0 %v3326_v39  ;;  %v3335_v31 = vld [vmem:[%s3872_s12 + $0x40] ss:$16 sps:$4 sm:$0xff]   ;;  %v3384_v39 = vld [vmem:[%s3885_s25 + $0xd8] sm:$0xff]  }
 0xce0   : > { %2251 = vmatprep.subr.bf16.mxu0 %v3334_v42  ;;  %2211 = vmatpush1.bf16.msra.mxu1 %v3335_v31  ;;  %v3387_v42 = vld [vmem:[%s3885_s25 + $0x60] sm:$0xff]   ;;  %v3392_v31 = vld [vmem:[%s3885_s25 + $0xe8] sm:$0xff]  }
 0xce1   : > { %2212 = vmatprep.subr.bf16.mxu1 %v3343_v56  ;;  %v3402_v56 = vld [vmem:[%s3885_s25 + $0xb8] sm:$0xff]  }
 0xce3   : > { %2252 = vmatpush1.bf16.msra.mxu0 %v3332_v45  ;;  %v3389_v45 = vld [vmem:[%s3885_s25 + $0x20] sm:$0xff]  }
 0xce4   : > { %2253 = vmatprep.subr.bf16.mxu0 %v3340_v47  ;;  %2213 = vmatpush1.bf16.msra.mxu1 %v3341_v58  ;;  %v3391_v47 = vld [vmem:[%s3885_s25 + $0x68] sm:$0xff]  }
 0xce5   : > { %2214 = vmatprep.subr.bf16.mxu1 %v3349_v60 }
 0xce7   : > { %2254 = vmatpush1.bf16.msra.mxu0 %v3338_v49  ;;  %v3393_v49 = vld [vmem:[%s3885_s25 + $0x28] sm:$0xff]  }
 0xce8   : > { %2255 = vmatprep.subr.bf16.mxu0 %v3346_v57  ;;  %2215 = vmatpush1.bf16.msra.mxu1 %v3347_v1 }
 0xce9   : > { %2216 = vmatprep.subr.bf16.mxu1 %v3355_v59 }
 0xceb   : > { %2256 = vmatpush1.bf16.msra.mxu0 %v3344_v44 }
 0xcec   : > { %2257 = vmatprep.subr.bf16.mxu0 %v3352_v62  ;;  %2217 = vmatpush1.bf16.msra.mxu1 %v3353_v17 }
 0xced   : > { %2218 = vmatprep.subr.bf16.mxu1 %v3361_v63 }
 0xcef   : > { %2258 = vmatpush1.bf16.msra.mxu0 %v3350_v2 }
 0xcf0   : > { %2259 = vmatprep.subr.bf16.mxu0 %v3358_v3  ;;  %2219 = vmatpush1.bf16.msra.mxu1 %v3359_v5 }
 0xcf1   : > { %2220 = vmatprep.subr.bf16.mxu1 %v3367_v9 }
 0xcf3   : > { %2260 = vmatpush1.bf16.msra.mxu0 %v3356_v13 }
 0xcf4   : > { %2261 = vmatprep.subr.bf16.mxu0 %v3364_v4  ;;  %2221 = vmatpush1.bf16.msra.mxu1 %v3365_v12 }
 0xcf5   : > { %3021 = vmatprep.subr.bf16.mxu1 %v3371_v18 }
 0xcf7   : > { %2262 = vmatpush1.bf16.msra.mxu0 %v3362_v8 }
 0xcf8   : > { %2263 = vmatprep.subr.bf16.mxu0 %v3370_v10 }
 0xcfb   : > { %2264 = vmatpush1.bf16.msra.mxu0 %v3368_v14 }
 0xcfc   : > { %3043 = vmatprep.subr.bf16.mxu0 %v3372_v15 }
 0xdb1   : > { %v1990_v50 = vpop.f32.mrb[28].mxu0 }
 0xdb2   : > { %v4245_v21 = vadd.f32 %v3475_v51, %v1990_v50  ;;  %v3199_v52 = vpop.f32.mrb[29].mxu0  ;;  %v3394_v50 = vld [vmem:[%s3885_s25 + $0xa8] sm:$0xff]   ;;  %v3395_v51 = vld [vmem:[%s3885_s25 + $0x70] sm:$0xff]  }
 0xdb3   : > { %v1993_v53 = vpop.f32.mrb[30].mxu0  ;;  %v3396_v52 = vld [vmem:[%s3885_s25 + $0xf0] sm:$0xff]  }
 0xdb4   : > { %v4247_v11 = vadd.f32 %v3476_v54, %v1993_v53  ;;  %v3200_v0 = vpop.f32.mrb[31].mxu0  ;;  %v1999_v28 = vmul.f32 %v4245_v21, %v4245_v21  ;;  %v3397_v53 = vld [vmem:[%s3885_s25 + $0x30] sm:$0xff]  }
 0xdb5   : > { %v3398_v54 = vld [vmem:[%s3885_s25 + $0xb0] sm:$0xff]   ;;  %v3399_v0 = vld [vmem:[%s3885_s25 + $0x78] sm:$0xff]  }
 0xdb6   : > { %2001 = vadd.xlane.f32.xlu1 %v1999_v28  ;;  %v2000_v55 = vmul.f32 %v4247_v11, %v4247_v11  ;;  %v3400_v28 = vld [vmem:[%s3885_s25 + $0xf8] sm:$0xff]  }
 0xdb8   : > { %2003 = vadd.xlane.f32.xlu0 %v2000_v55  ;;  %v3401_v55 = vld [vmem:[%s3885_s25 + $0x38] sm:$0xff]  }
 0xe43   : > { %v2002_v16 = vpop.xlane.xlu1 %2001 }
 0xe44   : > { %v2005_v7 = vmul.f32 0.0078125, %v2002_v16 }
 0xe45   : > { %v2004_v27 = vpop.xlane.xlu0 %2003 }
 0xe46   : > { %v2007_v19 = vadd.f32 1.1920929e-07, %v2005_v7  ;;  %v2006_v20 = vmul.f32 0.0078125, %v2004_v27 }
 0xe48   : > { %3471 = vrsqrt.f32 %v2007_v19  ;;  %v2008_v61 = vadd.f32 1.1920929e-07, %v2006_v20 }
 0xe4a   : > { %3473 = vrsqrt.f32 %v2008_v61 }
 0xe52   : > { %v3472_v22 = vpop.eup %3471 }
 0xe53   : > { %v2011_v24 = vmul.f32 %v3472_v22, %v4245_v21 }
 0xe54   : > { %v3474_v23 = vpop.eup %3473 }
 0xe55   : > { %v2012_v48 = vmul.f32 %v3474_v23, %v4247_v11 }
 0xe57   : > { %v2013_v29 = vpack.c.bf16 %v2012_v48, %v2011_v24 }
 0xe59   : > { %2239 = vmatmul.mubr.bf16.vlgmr.msra.gmra.mrb[44].mxu1 %v2013_v29  ;;  %2282 = vmatmul.mubr.bf16.vlgmr.msra.gmra.mrb[32].mxu0 %v2013_v29 }
 0xe5a   : > { %3022 = vmatpush3.bf16.msra.mxu1 %v3373_v25  ;;  %3044 = vmatpush3.bf16.msra.mxu0 %v3374_v26 }
 0xe5b   : > { %3023 = vmatprep.subr.bf16.mxu1 %v3375_v30  ;;  %3045 = vmatprep.subr.bf16.mxu0 %v3376_v32 }
 0xe5e   : > { %3024 = vmatpush3.bf16.msra.mxu1 %v3377_v33  ;;  %3046 = vmatpush3.bf16.msra.mxu0 %v3378_v34 }
 0xe5f   : > { %3025 = vmatprep.subr.bf16.mxu1 %v3379_v6  ;;  %3047 = vmatprep.subr.bf16.mxu0 %v3380_v35 }
 0xe62   : > { %3026 = vmatpush3.bf16.msra.mxu1 %v3381_v36  ;;  %3048 = vmatpush3.bf16.msra.mxu0 %v3382_v37 }
 0xe63   : > { %3027 = vmatprep.subr.bf16.mxu1 %v3383_v38  ;;  %3049 = vmatprep.subr.bf16.mxu0 %v3384_v39 }
 0xe66   : > { %3028 = vmatpush3.bf16.msra.mxu1 %v3385_v40  ;;  %3050 = vmatpush3.bf16.msra.mxu0 %v3386_v41 }
 0xe67   : > { %3029 = vmatprep.subr.bf16.mxu1 %v3387_v42  ;;  %3051 = vmatprep.subr.bf16.mxu0 %v3388_v43 }
 0xe6a   : > { %3030 = vmatpush3.bf16.msra.mxu1 %v3389_v45  ;;  %3052 = vmatpush3.bf16.msra.mxu0 %v3390_v46 }
 0xe6b   : > { %3031 = vmatprep.subr.bf16.mxu1 %v3391_v47  ;;  %3053 = vmatprep.subr.bf16.mxu0 %v3392_v31 }
 0xe6e   : > { %3032 = vmatpush3.bf16.msra.mxu1 %v3393_v49  ;;  %3054 = vmatpush3.bf16.msra.mxu0 %v3394_v50 }
 0xe6f   : > { %3033 = vmatprep.subr.bf16.mxu1 %v3395_v51  ;;  %3055 = vmatprep.subr.bf16.mxu0 %v3396_v52 }
 0xe72   : > { %3034 = vmatpush3.bf16.msra.mxu1 %v3397_v53  ;;  %3056 = vmatpush3.bf16.msra.mxu0 %v3398_v54 }
 0xe73   : > { %3035 = vmatprep.subr.bf16.mxu1 %v3399_v0  ;;  %3057 = vmatprep.subr.bf16.mxu0 %v3400_v28 }
 0xe76   : > { %3036 = vmatpush3.bf16.msra.mxu1 %v3401_v55  ;;  %3058 = vmatpush3.bf16.msra.mxu0 %v3402_v56 }
 0xf2c   : > { %v2240_v57 = vpop.f32.mrb[44].mxu1  ;;  %v2283_v58 = vpop.f32.mrb[32].mxu0 }
 0xf2d   : > { %v2292_v44 = vmax.f32 %v2240_v57, 0.0  ;;  %v2294_v60 = vmax.f32 %v2283_v58, 0.0  ;;  %v2242_v62 = vpop.f32.mrb[45].mxu1  ;;  %v2285_v1 = vpop.f32.mrb[33].mxu0 }
 0xf2e   : > { %v2293_v2 = vmax.f32 %v2242_v62, 0.0  ;;  %v2295_v59 = vmax.f32 %v2285_v1, 0.0  ;;  %v2244_v17 = vpop.f32.mrb[46].mxu1  ;;  %v2287_v13 = vpop.f32.mrb[34].mxu0 }
 0xf2f   : > { %v2296_v3 = vmax.f32 %v2244_v17, 0.0  ;;  %v2298_v63 = vmax.f32 %v2287_v13, 0.0  ;;  %v2246_v4 = vpop.f32.mrb[47].mxu1  ;;  %v2289_v5 = vpop.f32.mrb[35].mxu0  ;;  %v2300_v10 = vmul.f32 %v2292_v44, %v2292_v44  ;;  %v2302_v12 = vmul.f32 %v2294_v60, %v2294_v60 }
 0xf30   : > { %v2297_v8 = vmax.f32 %v2246_v4, 0.0  ;;  %v2299_v9 = vmax.f32 %v2289_v5, 0.0  ;;  %v2301_v15 = vmul.f32 %v2293_v2, %v2293_v2  ;;  %v2303_v16 = vmul.f32 %v2295_v59, %v2295_v59 }
 0xf31   : > { %v2304_v14 = vmul.f32 %v2296_v3, %v2296_v3  ;;  %v2306_v18 = vmul.f32 %v2298_v63, %v2298_v63 }
 0xf32   : > { %v2305_v7 = vmul.f32 %v2297_v8, %v2297_v8  ;;  %v2307_v27 = vmul.f32 %v2299_v9, %v2299_v9 }
 0xf33   : > { %v2308_v19 = vpack.c.bf16 %v2304_v14, %v2300_v10  ;;  %v2310_v20 = vpack.c.bf16 %v2306_v18, %v2302_v12 }
 0xf34   : > { %v2309_v61 = vpack.c.bf16 %v2305_v7, %v2301_v15  ;;  %v2311_v22 = vpack.c.bf16 %v2307_v27, %v2303_v16 }
 0xf36   : > { %2600 = vmatprep.mubr.bf16.mxu1 %v2309_v61  ;;  %2641 = vmatprep.mubr.bf16.mxu0 %v2311_v22 }
 0xf37   : > { %2601 = vmatmul.mubr.bf16.vlgmr.msra.gmra.mrb[48].mxu1 %v2308_v19  ;;  %2642 = vmatmul.mubr.bf16.vlgmr.msra.gmra.mrb[36].mxu0 %v2310_v20 }
0x100a   : > { %v3037_v23 = vpop.f32.mrb[48].mxu1  ;;  %v3059_v24 = vpop.f32.mrb[36].mxu0 }
0x100b   : > { %v3038_v48 = vpop.f32.mrb[49].mxu1  ;;  %v3060_v25 = vpop.f32.mrb[37].mxu0 }
0x100c   : > { %v3039_v26 = vadd.f32 %v3038_v48, %v3037_v23  ;;  %v3061_v29 = vadd.f32 %v3060_v25, %v3059_v24  ;;  %v3040_v30 = vpop.f32.mrb[50].mxu1  ;;  %v3062_v32 = vpop.f32.mrb[38].mxu0 }
0x100d   : > { %v3041_v33 = vpop.f32.mrb[51].mxu1  ;;  %v3063_v34 = vpop.f32.mrb[39].mxu0 }
0x100e   : > { %v2644_v6 = vadd.f32 %v3061_v29, %v3039_v26  ;;  %v3042_v35 = vadd.f32 %v3041_v33, %v3040_v30  ;;  %v3064_v36 = vadd.f32 %v3063_v34, %v3062_v32  ;;  %2657 = sbr.rel (%p2954_p7) target bundleno = 4282 (0x10ba), region = 72 }
0x1010   : > { %v2650_v37 = vadd.f32 %v2644_v6, %v4245_v21  ;;  %v2647_v38 = vadd.f32 %v3064_v36, %v3042_v35 }
0x1012   : > { %2652 = vst [vmem:[#allocation2] sm:$0xff] %v2650_v37  ;;  %v2651_v39 = vadd.f32 %v2647_v38, %v4247_v11  ;;  %v2658_v40 = vmul.f32 (!%p2954_p7), %v2650_v37, %v2650_v37 }
0x1014   : > { %2653 = vst [vmem:[#allocation2 + $0x8] sm:$0xff] %v2651_v39  ;;  %2660 = vadd.xlane.f32.xlu0 (!%p2954_p7), %v2658_v40  ;;  %v2659_v41 = vmul.f32 (!%p2954_p7), %v2651_v39, %v2651_v39 }
0x1018   : > { %2662 = vadd.xlane.f32.xlu0 %v2659_v41 }
0x10a1   : > { %v2661_v42 = vpop.xlane.xlu0 %2660 }
0x10a2   : > { %v2664_v43 = vmul.f32 0.0078125, %v2661_v42 }
0x10a4   : > { %v2666_v45 = vadd.f32 1.1920929e-07, %v2664_v43 }
0x10a5   : > { %v2663_v46 = vpop.xlane.xlu0 %2662 }
0x10a6   : > { %v2665_v47 = vmul.f32 0.0078125, %v2663_v46  ;;  %3477 = vrsqrt.f32 %v2666_v45 }
0x10a8   : > { %v2667_v31 = vadd.f32 1.1920929e-07, %v2665_v47 }
0x10aa   : > { %3479 = vrsqrt.f32 %v2667_v31 }
0x10b0   : > { %v3478_v21 = vpop.eup %3477 }
0x10b1   : > { %v2670_v50 = vmul.f32 %v3478_v21, %v2650_v37 }
0x10b4   : > { %v3480_v49 = vpop.eup %3479 }
0x10b5   : > { %v2671_v11 = vmul.f32 %v3480_v49, %v2651_v39 }
0x10b7   : > { %v2969_v51 = vpack.c.bf16 %v2671_v11, %v2670_v50 }
0x10b9   : > { %2970 = vst [vmem:[%s4339_s8] sm:$0xff] %v2969_v51  }
0x10ba PF: > { %s24_s10 = sadd.s32 1, %s3625_s10   ;;  %s4360_s13 = sld [smem:[#allocation13_spill]] }
0x10bb   : > { %p21_p13 = scmp.ge.s32.totalorder %s24_s10, 4   ;;  %s4361_s30 = sld [smem:[#allocation11_spill]] }
0x10bc   : > { %s4362_s9 = sld [smem:[#allocation12_spill]]  ;;  %s4363_s27 = smov %s3609_s28 }
0x10bd   : > { %s4364_s28 = smov %s3613_s29  ;;  %23 = sbr.rel (!%p21_p13) target bundleno = 8 (0x8), region = 130 }
0x10c0   : > { %s4365_s29 = smov %s4360_s13 }
0x10c4   :  { %2704 = vsyncpa [#allocation5], 1 }
0x10c5   :  { %2706 = vsyncpa [#allocation5 + $0x1], 1 }
0x10c6   :  { %2707 = vsyncpa [#allocation7], 1 }
0x10c7   :  { %2709 = vsyncpa [#allocation7 + $0x1], 1 }

</bundles_post_ra>
